<compile_context>
chip_gen: v7x
topology: tpu7x:2x2x1
jax: 0.10.0
libtpu: 0.0.40
codegen_flags: <defaults>
</compile_context>

<pallas_src>
import functools

import jax
import jax.numpy as jnp
import numpy as np
from jax import lax
from jax.experimental import pallas as pl
from jax.experimental.pallas import tpu as pltpu

_HALO = 16   # >= 10 rows are needed by the fused chain (3+1+3+3); 16 keeps slices sublane-aligned
_EPS = 1e-5


# ----------------------------------------------------------------------------
# in-kernel helpers
# ----------------------------------------------------------------------------
def _leaky(v):
    return jnp.where(v > 0, v, 0.2 * v)


def _mask_time(v, t_first, T):
    """Zero rows (rows = time) whose absolute time lies outside [0, T).

    Reproduces the per-stage zero padding of the un-fused reference at the
    sequence boundaries (only bites on the first / last time tile)."""
    t = t_first + lax.broadcasted_iota(jnp.int32, v.shape, 0)
    return jnp.where((t >= 0) & (t < T), v, 0.0)


def _dilated(h, wd, bd, wp, bp, *, d, C):
    """DilatedBlock on a time-major slab that carries a d-row halo on each side."""
    R = h.shape[0] - 2 * d
    z = jnp.dot(h, wd, preferred_element_type=jnp.float32)                 # (Rin, 3C)
    y = z[0:R, 0:C] + z[d:d + R, C:2 * C] + z[2 * d:2 * d + R, 2 * C:3 * C] + bd
    out = jnp.dot(y, wp, preferred_element_type=jnp.float32) + bp + h[d:d + R, :]
    return _leaky(out)


# ----------------------------------------------------------------------------
# fused kernel: conv1 -> dilated(1) -> dilated(3) -> conv2(stride 4) -> LN stats
# ----------------------------------------------------------------------------
def _fused_kernel(x_ref, xl_ref, xr_ref, step_ref,
                  w1_ref, b1_ref,
                  wd1_ref, bd1_ref, wp1_ref, bp1_ref,
                  wd3_ref, bd3_ref, wp3_ref, bp3_ref,
                  w2h_ref, wsf_ref, ws0_ref, b2_ref,
                  y_ref, st_ref,
                  h3_scr,
                  *, TT, TTo, T, C, Cout, H):
    i = pl.program_id(1)
    t0 = i * TT

    # haloed input tile, time-major: row r <-> absolute time t0 - H + r
    xe = jnp.concatenate([xl_ref[0, 0].T, x_ref[0].T, xr_ref[0, 0].T], axis=0)  # (TT+2H, Cin)

    # ---- conv1 (k=7, pad=3) + leaky: 7 taps stacked along N -> one MXU call ----
    z1 = jnp.dot(xe, w1_ref[...], preferred_element_type=jnp.float32)            # (TT+2H, 7*Cout)
    R1 = TT + 14                                   # h rows <-> times [t0-7, t0+TT+7)
    off = H - 10
    h = z1[off:off + R1, 0:Cout]
    for k in range(1, 7):
        h = h + z1[off + k:off + k + R1, k * Cout:(k + 1) * Cout]
    h = _leaky(h + b1_ref[...])
    h = _mask_time(h, t0 - 7, T)

    # ---- DilatedBlock(d=1), DilatedBlock(d=3) ----
    h = _dilated(h, wd1_ref[...], bd1_ref[...], wp1_ref[...], bp1_ref[...], d=1, C=C)
    h = _mask_time(h, t0 - 6, T)                   # rows <-> [t0-6, t0+TT+6)
    h = _dilated(h, wd3_ref[...], bd3_ref[...], wp3_ref[...], bp3_ref[...], d=3, C=C)
    h = _mask_time(h, t0 - 3, T)                   # rows <-> [t0-3, t0+TT+3), shape (TT+6, C)

    # ---- conv2 (k=7, stride=4, pad=3) + step channels + leaky ----
    # h3 goes through a VMEM scratch so the stride-4 taps are plain strided row reads.
    h3_scr[0:TT + 6, :] = h
    step_v = step_ref[0]                                                           # (1, 33)
    s_full = jnp.dot(step_v, wsf_ref[...], preferred_element_type=jnp.float32)     # (1, Cout)
    s_first = jnp.dot(step_v, ws0_ref[...], preferred_element_type=jnp.float32)    # (1, Cout)
    row = lax.broadcasted_iota(jnp.int32, (TTo, Cout), 0)
    # output J=0 loses taps 0..2 of the step channels to the left zero padding
    acc = jnp.where((row == 0) & (i == 0), s_first, s_full) + b2_ref[...]
    for k in range(7):
        hk = h3_scr[pl.ds(k, TTo, 4), :]                                           # rows k, k+4, ...
        acc = acc + jnp.dot(hk, w2h_ref[k * C:(k + 1) * C, :],
                            preferred_element_type=jnp.float32)
    y2 = _leaky(acc)                                                               # (TTo, Cout)

    # ---- store channel-major (lane-dense) + LayerNorm partial statistics ----
    y_ref[0] = y2.T.astype(y_ref.dtype)

    lane = lax.broadcasted_iota(jnp.int32, (1, 128), 1)
    vec = (jnp.where(lane == 0, jnp.sum(y2), 0.0)
           + jnp.where(lane == 1, jnp.sum(y2 * y2), 0.0))

    @pl.when(i == 0)
    def _():
        st_ref[...] = jnp.zeros_like(st_ref)

    st_ref[0] = st_ref[0] + vec


# ----------------------------------------------------------------------------
# second pass: tiled LayerNorm apply (stats were accumulated by the fused kernel)
# ----------------------------------------------------------------------------
def _norm_kernel(y_ref, st_ref, o_ref, *, n_elems):
    sv = st_ref[0]                                       # (1, 128): lane0 = sum, lane1 = sumsq
    lane = lax.broadcasted_iota(jnp.int32, (1, 128), 1)
    s = jnp.sum(jnp.where(lane == 0, sv, 0.0))
    ss = jnp.sum(jnp.where(lane == 1, sv, 0.0))
    mean = s / n_elems
    var = ss / n_elems - mean * mean
    rstd = lax.rsqrt(var + _EPS)
    o_ref[0] = ((y_ref[0] - mean) * rstd).astype(o_ref.dtype)


# ----------------------------------------------------------------------------
# wrapper
# ----------------------------------------------------------------------------
def _pick_out_tile(To, cap):
    """Output-time tile: full To if small, else the largest multiple of 128 dividing To."""
    if To <= cap:
        return To
    tt = (min(cap, To) // 128) * 128
    while tt >= 128:
        if To % tt == 0:
            return tt
        tt -= 128
    return To   # TODO(synk): ragged To -> falls back to a single big tile


def downsampling_block(x, step, params, *, tto_cap=512):
    """x: (B, Cin, T) NCW, step: (B, 33)  ->  (B, Cout, T // 4)."""
    B, Cin, T = x.shape
    Cout = params["w1"].shape[0]
    C = Cout
    S = params["w2"].shape[1] - C
    assert step.shape[-1] == S
    assert T % 4 == 0, "TODO(synk): general output-length handling for T % 4 != 0"
    To = T // 4
    TTo = _pick_out_tile(To, tto_cap)
    NT = To // TTo
    TT = 4 * TTo
    H = _HALO

    # Per-tile edge slabs (H rows each) instead of a full haloed copy of the activation.
    if NT == 1:
        xl = jnp.zeros((B, 1, Cin, H), x.dtype)
        xr = jnp.zeros((B, 1, Cin, H), x.dtype)
    else:
        xt = x.reshape(B, Cin, NT, TT)
        tails = jnp.transpose(xt[:, :, :, TT - H:], (0, 2, 1, 3))          # (B, NT, Cin, H)
        heads = jnp.transpose(xt[:, :, :, :H], (0, 2, 1, 3))
        zedge = jnp.zeros((B, 1, Cin, H), x.dtype)
        xl = jnp.concatenate([zedge, tails[:, :-1]], axis=1)               # prev-tile tail
        xr = jnp.concatenate([heads[:, 1:], zedge], axis=1)                # next-tile head

    # Weight repacking (tiny, once per call).
    w1 = params["w1"]                                                      # (Cout, Cin, 7)
    w1cat = jnp.concatenate([w1[:, :, k].T for k in range(7)], axis=1)     # (Cin, 7*Cout)
    b1 = params["b1"].reshape(1, Cout)
    wd1 = jnp.concatenate([params["wd1"][:, :, k].T for k in range(3)], axis=1)
    bd1 = params["bd1"].reshape(1, C)
    wp1 = params["wp1"][:, :, 0].T
    bp1 = params["bp1"].reshape(1, C)
    wd3 = jnp.concatenate([params["wd2"][:, :, k].T for k in range(3)], axis=1)
    bd3 = params["bd2"].reshape(1, C)
    wp3 = params["wp2"][:, :, 0].T
    bp3 = params["bp2"].reshape(1, C)
    w2 = params["w2"]                                                      # (Cout, C+S, 7)
    w2h = jnp.concatenate([w2[:, :C, k].T for k in range(7)], axis=0)      # (7*C, Cout)
    wsf = jnp.sum(w2[:, C:, :], axis=2).T                                  # (S, Cout): all 7 taps
    ws0 = jnp.sum(w2[:, C:, 3:], axis=2).T                                 # (S, Cout): taps 3..6 (J == 0)
    b2 = params["b2"].reshape(1, Cout)
    step_in = step.reshape(B, 1, S)

    flops = int(2 * B * T * (Cin * 7 * Cout + 2 * (3 * C * C + C * C))
                + 2 * B * To * (7 * C + 2 * S) * Cout)
    bytes_accessed = int(4 * (B * Cin * T + B * Cout * To + B * (128 + S)))

    kernel = functools.partial(_fused_kernel, TT=TT, TTo=TTo, T=T, C=C, Cout=Cout, H=H)
    wspec = lambda r, c: pl.BlockSpec((r, c), lambda b, i: (0, 0))

    y_pre, stats = pl.pallas_call(
        kernel,
        out_shape=(jax.ShapeDtypeStruct((B, Cout, To), x.dtype),
                   jax.ShapeDtypeStruct((B, 1, 128), jnp.float32)),
        grid_spec=pltpu.PrefetchScalarGridSpec(
            num_scalar_prefetch=0,
            grid=(B, NT),
            in_specs=[
                pl.BlockSpec((1, Cin, TT), lambda b, i: (b, 0, i)),        # native NCW input
                pl.BlockSpec((1, 1, Cin, H), lambda b, i: (b, i, 0, 0)),   # left halo slab
                pl.BlockSpec((1, 1, Cin, H), lambda b, i: (b, i, 0, 0)),   # right halo slab
                pl.BlockSpec((1, 1, S), lambda b, i: (b, 0, 0)),           # step (no time broadcast)
                wspec(Cin, 7 * Cout), wspec(1, Cout),
                wspec(C, 3 * C), wspec(1, C), wspec(C, C), wspec(1, C),
                wspec(C, 3 * C), wspec(1, C), wspec(C, C), wspec(1, C),
                wspec(7 * C, Cout), wspec(S, Cout), wspec(S, Cout), wspec(1, Cout),
            ],
            out_specs=[
                pl.BlockSpec((1, Cout, TTo), lambda b, i: (b, 0, i)),      # lane-dense store
                pl.BlockSpec((1, 1, 128), lambda b, i: (b, 0, 0)),         # resident LN stats
            ],
            scratch_shapes=[pltpu.VMEM((TT + 8, C), jnp.float32)],
        ),
        compiler_params=pltpu.CompilerParams(
            dimension_semantics=("parallel", "arbitrary"),
            vmem_limit_bytes=32 * 1024 * 1024),
        cost_estimate=pl.CostEstimate(flops=flops, transcendentals=0,
                                      bytes_accessed=bytes_accessed),
    )(x, xl, xr, step_in, w1cat, b1, wd1, bd1, wp1, bp1, wd3, bd3, wp3, bp3,
      w2h, wsf, ws0, b2)

    out = pl.pallas_call(
        functools.partial(_norm_kernel, n_elems=float(Cout * To)),
        out_shape=jax.ShapeDtypeStruct((B, Cout, To), x.dtype),
        grid_spec=pltpu.PrefetchScalarGridSpec(
            num_scalar_prefetch=0,
            grid=(B, NT),
            in_specs=[
                pl.BlockSpec((1, Cout, TTo), lambda b, i: (b, 0, i)),
                pl.BlockSpec((1, 1, 128), lambda b, i: (b, 0, 0)),
            ],
            out_specs=pl.BlockSpec((1, Cout, TTo), lambda b, i: (b, 0, i)),
        ),
        compiler_params=pltpu.CompilerParams(
            dimension_semantics=("parallel", "parallel"),
            vmem_limit_bytes=32 * 1024 * 1024),
        input_output_aliases={0: 0},
        cost_estimate=pl.CostEstimate(flops=int(4 * B * Cout * To), transcendentals=int(B),
                                      bytes_accessed=int(8 * B * Cout * To)),
    )(y_pre, stats)
    return out


# ----------------------------------------------------------------------------
# pure-JAX reference mirroring the PyTorch forward
# ----------------------------------------------------------------------------
def _reference(x_ncw, step, params):
    def conv(x, w, b, stride=1, padding=0, dilation=1):
        dn = ("NCH", "OIH", "NCH")
        y = lax.conv_general_dilated(x, w, (stride,), [(padding, padding)],
                                     rhs_dilation=(dilation,), dimension_numbers=dn)
        return y + b[None, :, None]

    h = _leaky(conv(x_ncw, params["w1"], params["b1"], padding=3))
    for (wd, bd, wp, bp, d) in [
            (params["wd1"], params["bd1"], params["wp1"], params["bp1"], 1),
            (params["wd2"], params["bd2"], params["wp2"], params["bp2"], 3)]:
        y = conv(h, wd, bd, padding=d, dilation=d)
        y = conv(y, wp, bp)
        h = _leaky(y + h)
    B = x_ncw.shape[0]
    Tl = h.shape[-1]
    stepb = jnp.broadcast_to(step[:, :, None], (B, step.shape[-1], Tl))
    hc = jnp.concatenate([h, stepb], axis=1)
    z = _leaky(conv(hc, params["w2"], params["b2"], stride=4, padding=3))
    m = jnp.mean(z, axis=(1, 2), keepdims=True)
    v = jnp.mean((z - m) ** 2, axis=(1, 2), keepdims=True)
    return (z - m) / jnp.sqrt(v + _EPS)


# ----------------------------------------------------------------------------
# demo / self-check
# ----------------------------------------------------------------------------
if __name__ == "__main__":
    def u(k, shape, fan):
        bound = 1.0 / np.sqrt(fan)
        return jax.random.uniform(k, shape, jnp.float32, -bound, bound)

    def make_params(key, Cin, Cout):
        ks = jax.random.split(key, 12)
        return dict(
            w1=u(ks[0], (Cout, Cin, 7), Cin * 7),    b1=u(ks[1], (Cout,), Cin * 7),
            wd1=u(ks[2], (Cout, Cout, 3), Cout * 3), bd1=u(ks[3], (Cout,), Cout * 3),
            wp1=u(ks[4], (Cout, Cout, 1), Cout),     bp1=u(ks[5], (Cout,), Cout),
            wd2=u(ks[6], (Cout, Cout, 3), Cout * 3), bd2=u(ks[7], (Cout,), Cout * 3),
            wp2=u(ks[8], (Cout, Cout, 1), Cout),     bp2=u(ks[9], (Cout,), Cout),
            w2=u(ks[10], (Cout, Cout + 33, 7), (Cout + 33) * 7),
            b2=u(ks[11], (Cout,), (Cout + 33) * 7),
        )

    root = jax.random.PRNGKey(0)
    kp, kx, ks_, kx2, ks2 = jax.random.split(root, 5)

    B, Cin, Cout, T = 2, 4, 8, 16
    params = make_params(kp, Cin, Cout)

    # small shape (single time tile per batch)
    x = jax.random.normal(kx, (B, Cin, T), jnp.float32)
    step = jax.random.normal(ks_, (B, 33), jnp.float32)
    out = jax.block_until_ready(jax.jit(downsampling_block)(x, step, params))
    ref = jax.block_until_ready(_reference(x, step, params))
    np.testing.assert_allclose(np.asarray(out), np.asarray(ref), rtol=1e-4, atol=1e-4)

    # longer sequence: exercises multi-tile halos, boundary masks and the two-pass LayerNorm
    T2 = 2048
    x_long = jax.random.normal(kx2, (B, Cin, T2), jnp.float32)
    step_long = jax.random.normal(ks2, (B, 33), jnp.float32)
    fn_long = jax.jit(functools.partial(downsampling_block, tto_cap=128))
    out2 = jax.block_until_ready(fn_long(x_long, step_long, params))
    ref2 = jax.block_until_ready(_reference(x_long, step_long, params))
    np.testing.assert_allclose(np.asarray(out2), np.asarray(ref2), rtol=1e-4, atol=1e-4)

    print("KERNEL_OK")
</pallas_src>

<mosaic_0001>
module attributes {stable_mosaic.version = 11 : i64} {
  func.func @_norm_kernel(%arg0: i32, %arg1: i32, %arg2: memref<1x8x4xf32, #tpu.memory_space<vmem>>, %arg3: memref<1x1x128xf32, #tpu.memory_space<vmem>>, %arg4: memref<1x8x4xf32, #tpu.memory_space<vmem>>) attributes {dimension_semantics = [#tpu.dimension_semantics<parallel>, #tpu.dimension_semantics<parallel>], iteration_bounds = array<i64: 2, 1>, scalar_prefetch = 0 : i64, scratch_operands = 0 : i64, tpu.core_type = #tpu.core_type<tc>, window_params = [{transform_indices = @transform_0, window_bounds = array<i64: 1, 8, 4>}, {transform_indices = @transform_1, window_bounds = array<i64: 1, 1, 128>}, {transform_indices = @transform_2, window_bounds = array<i64: 1, 8, 4>}]} {
    %c0 = arith.constant 0 : index
    %c0_0 = arith.constant 0 : index
    %c0_1 = arith.constant 0 : index
    %0 = vector.load %arg3[%c0, %c0_0, %c0_1] : memref<1x1x128xf32, #tpu.memory_space<vmem>>, vector<1x1x128xf32>
    %1 = vector.shape_cast %0 : vector<1x1x128xf32> to vector<1x128xf32>
    %2 = tpu.iota {dimensions = array<i32: 1>} : vector<1x128xi32>
    %c0_i32 = arith.constant 0 : i32
    %3 = vector.broadcast %c0_i32 : i32 to vector<1x128xi32>
    %4 = arith.cmpi eq, %2, %3 : vector<1x128xi32>
    %cst = arith.constant 0.000000e+00 : f32
    %5 = vector.broadcast %cst : f32 to vector<1x128xf32>
    %6 = arith.select %4, %1, %5 : vector<1x128xi1>, vector<1x128xf32>
    %7 = vector.shape_cast %6 : vector<1x128xf32> to vector<1x1x128xf32>
    %cst_2 = arith.constant dense<0.000000e+00> : vector<1xf32>
    %8 = vector.multi_reduction <add>, %7, %cst_2 [1, 2] : vector<1x1x128xf32> to vector<1xf32>
    %9 = vector.shape_cast %8 : vector<1xf32> to vector<1x1x1xf32>
    %10 = vector.extract %9[0, 0, 0] : f32 from vector<1x1x1xf32>
    %c1_i32 = arith.constant 1 : i32
    %11 = vector.broadcast %c1_i32 : i32 to vector<1x128xi32>
    %12 = arith.cmpi eq, %2, %11 : vector<1x128xi32>
    %cst_3 = arith.constant 0.000000e+00 : f32
    %13 = vector.broadcast %cst_3 : f32 to vector<1x128xf32>
    %14 = arith.select %12, %1, %13 : vector<1x128xi1>, vector<1x128xf32>
    %15 = vector.shape_cast %14 : vector<1x128xf32> to vector<1x1x128xf32>
    %cst_4 = arith.constant dense<0.000000e+00> : vector<1xf32>
    %16 = vector.multi_reduction <add>, %15, %cst_4 [1, 2] : vector<1x1x128xf32> to vector<1xf32>
    %17 = vector.shape_cast %16 : vector<1xf32> to vector<1x1x1xf32>
    %18 = vector.extract %17[0, 0, 0] : f32 from vector<1x1x1xf32>
    %cst_5 = arith.constant 3.200000e+01 : f32
    %19 = arith.divf %10, %cst_5 : f32
    %cst_6 = arith.constant 3.200000e+01 : f32
    %20 = arith.divf %18, %cst_6 : f32
    %21 = arith.mulf %19, %19 : f32
    %22 = arith.subf %20, %21 : f32
    %cst_7 = arith.constant 9.99999974E-6 : f32
    %23 = arith.addf %22, %cst_7 : f32
    %24 = math.rsqrt %23 : f32
    %c0_8 = arith.constant 0 : index
    %c0_9 = arith.constant 0 : index
    %c0_10 = arith.constant 0 : index
    %25 = vector.load %arg2[%c0_8, %c0_9, %c0_10] : memref<1x8x4xf32, #tpu.memory_space<vmem>>, vector<1x8x4xf32>
    %26 = vector.shape_cast %25 : vector<1x8x4xf32> to vector<8x4xf32>
    %27 = vector.broadcast %19 : f32 to vector<8x4xf32>
    %28 = arith.subf %26, %27 : vector<8x4xf32>
    %29 = vector.broadcast %24 : f32 to vector<8x4xf32>
    %30 = arith.mulf %28, %29 : vector<8x4xf32>
    %c0_11 = arith.constant 0 : index
    %c0_12 = arith.constant 0 : index
    %c0_13 = arith.constant 0 : index
    %31 = vector.load %arg4[%c0_11, %c0_12, %c0_13] : memref<1x8x4xf32, #tpu.memory_space<vmem>>, vector<1x8x4xf32>
    %32 = vector.shape_cast %31 : vector<1x8x4xf32> to vector<8x4xf32>
    %33 = vector.shape_cast %30 : vector<8x4xf32> to vector<1x8x4xf32>
    tpu.vector_store %arg4[%c0_11, %c0_12, %c0_13], %33 {strides = array<i32>} : memref<1x8x4xf32, #tpu.memory_space<vmem>>, vector<1x8x4xf32>,
    return
  }
  func.func @transform_0(%arg0: i32, %arg1: i32) -> (i32, i32, i32) {
    %c0_i32 = arith.constant 0 : i32
    %c0_i32_0 = arith.constant 0 : i32
    return %arg0, %c0_i32, %arg1 : i32, i32, i32
  }
  func.func @transform_1(%arg0: i32, %arg1: i32) -> (i32, i32, i32) {
    %c0_i32 = arith.constant 0 : i32
    %c0_i32_0 = arith.constant 0 : i32
    %c0_i32_1 = arith.constant 0 : i32
    return %arg0, %c0_i32, %c0_i32_0 : i32, i32, i32
  }
  func.func @transform_2(%arg0: i32, %arg1: i32) -> (i32, i32, i32) {
    %c0_i32 = arith.constant 0 : i32
    %c0_i32_0 = arith.constant 0 : i32
    return %arg0, %c0_i32, %arg1 : i32, i32, i32
  }
}

module attributes {stable_mosaic.version = 11 : i64} {
  func.func @_fused_kernel(%arg0: i32, %arg1: i32, %arg2: memref<1x4x16xf32, #tpu.memory_space<vmem>>, %arg3: memref<1x1x4x16xf32, #tpu.memory_space<vmem>>, %arg4: memref<1x1x4x16xf32, #tpu.memory_space<vmem>>, %arg5: memref<1x1x33xf32, #tpu.memory_space<vmem>>, %arg6: memref<4x56xf32, #tpu.memory_space<vmem>>, %arg7: memref<1x8xf32, #tpu.memory_space<vmem>>, %arg8: memref<8x24xf32, #tpu.memory_space<vmem>>, %arg9: memref<1x8xf32, #tpu.memory_space<vmem>>, %arg10: memref<8x8xf32, #tpu.memory_space<vmem>>, %arg11: memref<1x8xf32, #tpu.memory_space<vmem>>, %arg12: memref<8x24xf32, #tpu.memory_space<vmem>>, %arg13: memref<1x8xf32, #tpu.memory_space<vmem>>, %arg14: memref<8x8xf32, #tpu.memory_space<vmem>>, %arg15: memref<1x8xf32, #tpu.memory_space<vmem>>, %arg16: memref<56x8xf32, #tpu.memory_space<vmem>>, %arg17: memref<33x8xf32, #tpu.memory_space<vmem>>, %arg18: memref<33x8xf32, #tpu.memory_space<vmem>>, %arg19: memref<1x8xf32, #tpu.memory_space<vmem>>, %arg20: memref<1x8x4xf32, #tpu.memory_space<vmem>>, %arg21: memref<1x1x128xf32, #tpu.memory_space<vmem>>, %arg22: memref<24x8xf32, #tpu.memory_space<vmem>>) attributes {dimension_semantics = [#tpu.dimension_semantics<parallel>, #tpu.dimension_semantics<arbitrary>], iteration_bounds = array<i64: 2, 1>, scalar_prefetch = 0 : i64, scratch_operands = 1 : i64, tpu.core_type = #tpu.core_type<tc>, window_params = [{transform_indices = @transform_0, window_bounds = array<i64: 1, 4, 16>}, {transform_indices = @transform_1, window_bounds = array<i64: 1, 1, 4, 16>}, {transform_indices = @transform_2, window_bounds = array<i64: 1, 1, 4, 16>}, {transform_indices = @transform_3, window_bounds = array<i64: 1, 1, 33>}, {pipeline_mode = #tpu.pipeline_mode<synchronous>, transform_indices = @transform_4, window_bounds = array<i64: 4, 56>}, {pipeline_mode = #tpu.pipeline_mode<synchronous>, transform_indices = @transform_5, window_bounds = array<i64: 1, 8>}, {pipeline_mode = #tpu.pipeline_mode<synchronous>, transform_indices = @transform_6, window_bounds = array<i64: 8, 24>}, {pipeline_mode = #tpu.pipeline_mode<synchronous>, transform_indices = @transform_7, window_bounds = array<i64: 1, 8>}, {pipeline_mode = #tpu.pipeline_mode<synchronous>, transform_indices = @transform_8, window_bounds = array<i64: 8, 8>}, {pipeline_mode = #tpu.pipeline_mode<synchronous>, transform_indices = @transform_9, window_bounds = array<i64: 1, 8>}, {pipeline_mode = #tpu.pipeline_mode<synchronous>, transform_indices = @transform_10, window_bounds = array<i64: 8, 24>}, {pipeline_mode = #tpu.pipeline_mode<synchronous>, transform_indices = @transform_11, window_bounds = array<i64: 1, 8>}, {pipeline_mode = #tpu.pipeline_mode<synchronous>, transform_indices = @transform_12, window_bounds = array<i64: 8, 8>}, {pipeline_mode = #tpu.pipeline_mode<synchronous>, transform_indices = @transform_13, window_bounds = array<i64: 1, 8>}, {pipeline_mode = #tpu.pipeline_mode<synchronous>, transform_indices = @transform_14, window_bounds = array<i64: 56, 8>}, {pipeline_mode = #tpu.pipeline_mode<synchronous>, transform_indices = @transform_15, window_bounds = array<i64: 33, 8>}, {pipeline_mode = #tpu.pipeline_mode<synchronous>, transform_indices = @transform_16, window_bounds = array<i64: 33, 8>}, {pipeline_mode = #tpu.pipeline_mode<synchronous>, transform_indices = @transform_17, window_bounds = array<i64: 1, 8>}, {transform_indices = @transform_18, window_bounds = array<i64: 1, 8, 4>}, {transform_indices = @transform_19, window_bounds = array<i64: 1, 1, 128>}]} {
    %c16_i32 = arith.constant 16 : i32
    %0 = arith.muli %arg1, %c16_i32 : i32
    %c0 = arith.constant 0 : index
    %c0_0 = arith.constant 0 : index
    %c0_1 = arith.constant 0 : index
    %c0_2 = arith.constant 0 : index
    %1 = vector.load %arg3[%c0, %c0_0, %c0_1, %c0_2] : memref<1x1x4x16xf32, #tpu.memory_space<vmem>>, vector<1x1x4x16xf32>
    %2 = vector.shape_cast %1 : vector<1x1x4x16xf32> to vector<4x16xf32>
    %3 = tpu.transpose %2, [1, 0] : vector<4x16xf32> -> vector<16x4xf32>
    %c0_3 = arith.constant 0 : index
    %c0_4 = arith.constant 0 : index
    %c0_5 = arith.constant 0 : index
    %4 = vector.load %arg2[%c0_3, %c0_4, %c0_5] : memref<1x4x16xf32, #tpu.memory_space<vmem>>, vector<1x4x16xf32>
    %5 = vector.shape_cast %4 : vector<1x4x16xf32> to vector<4x16xf32>
    %6 = tpu.transpose %5, [1, 0] : vector<4x16xf32> -> vector<16x4xf32>
    %c0_6 = arith.constant 0 : index
    %c0_7 = arith.constant 0 : index
    %c0_8 = arith.constant 0 : index
    %c0_9 = arith.constant 0 : index
    %7 = vector.load %arg4[%c0_6, %c0_7, %c0_8, %c0_9] : memref<1x1x4x16xf32, #tpu.memory_space<vmem>>, vector<1x1x4x16xf32>
    %8 = vector.shape_cast %7 : vector<1x1x4x16xf32> to vector<4x16xf32>
    %9 = tpu.transpose %8, [1, 0] : vector<4x16xf32> -> vector<16x4xf32>
    %10 = tpu.concatenate %3, %6, %9 in 0 : vector<16x4xf32>, vector<16x4xf32>, vector<16x4xf32> -> vector<48x4xf32>
    %c0_10 = arith.constant 0 : index
    %c0_11 = arith.constant 0 : index
    %11 = vector.load %arg6[%c0_10, %c0_11] : memref<4x56xf32, #tpu.memory_space<vmem>>, vector<4x56xf32>
    %cst = arith.constant dense<0.000000e+00> : vector<48x56xf32>
    %12 = tpu.matmul %10, %11, %cst {dimension_numbers = #tpu.dot_dimension_numbers<[1], [0], [0], [1], [0, 0, 1, 1], [], []>} : vector<48x4xf32>, vector<4x56xf32>, vector<48x56xf32> -> vector<48x56xf32>
    %13 = vector.extract_strided_slice %12 {offsets = [6, 0], sizes = [30, 8], strides = [1, 1]} : vector<48x56xf32> to vector<30x8xf32>
    %14 = vector.extract_strided_slice %12 {offsets = [7, 8], sizes = [30, 8], strides = [1, 1]} : vector<48x56xf32> to vector<30x8xf32>
    %15 = arith.addf %13, %14 : vector<30x8xf32>
    %16 = vector.extract_strided_slice %12 {offsets = [8, 16], sizes = [30, 8], strides = [1, 1]} : vector<48x56xf32> to vector<30x8xf32>
    %17 = arith.addf %15, %16 : vector<30x8xf32>
    %18 = vector.extract_strided_slice %12 {offsets = [9, 24], sizes = [30, 8], strides = [1, 1]} : vector<48x56xf32> to vector<30x8xf32>
    %19 = arith.addf %17, %18 : vector<30x8xf32>
    %20 = vector.extract_strided_slice %12 {offsets = [10, 32], sizes = [30, 8], strides = [1, 1]} : vector<48x56xf32> to vector<30x8xf32>
    %21 = arith.addf %19, %20 : vector<30x8xf32>
    %22 = vector.extract_strided_slice %12 {offsets = [11, 40], sizes = [30, 8], strides = [1, 1]} : vector<48x56xf32> to vector<30x8xf32>
    %23 = arith.addf %21, %22 : vector<30x8xf32>
    %24 = vector.extract_strided_slice %12 {offsets = [12, 48], sizes = [30, 8], strides = [1, 1]} : vector<48x56xf32> to vector<30x8xf32>
    %25 = arith.addf %23, %24 : vector<30x8xf32>
    %c0_12 = arith.constant 0 : index
    %c0_13 = arith.constant 0 : index
    %26 = vector.load %arg7[%c0_12, %c0_13] : memref<1x8xf32, #tpu.memory_space<vmem>>, vector<1x8xf32>
    %27 = vector.broadcast %26 : vector<1x8xf32> to vector<30x8xf32>
    %28 = arith.addf %25, %27 : vector<30x8xf32>
    %cst_14 = arith.constant 0.000000e+00 : f32
    %29 = vector.broadcast %cst_14 : f32 to vector<30x8xf32>
    %30 = arith.cmpf ogt, %28, %29 : vector<30x8xf32>
    %cst_15 = arith.constant 2.000000e-01 : f32
    %31 = vector.broadcast %cst_15 : f32 to vector<30x8xf32>
    %32 = arith.mulf %31, %28 : vector<30x8xf32>
    %33 = arith.select %30, %28, %32 : vector<30x8xi1>, vector<30x8xf32>
    %c7_i32 = arith.constant 7 : i32
    %34 = arith.subi %0, %c7_i32 : i32
    %35 = tpu.iota {dimensions = array<i32: 0>} : vector<30x8xi32>
    %36 = vector.broadcast %34 : i32 to vector<30x8xi32>
    %37 = arith.addi %36, %35 : vector<30x8xi32>
    %c0_i32 = arith.constant 0 : i32
    %38 = vector.broadcast %c0_i32 : i32 to vector<30x8xi32>
    %39 = arith.cmpi sge, %37, %38 : vector<30x8xi32>
    %c16_i32_16 = arith.constant 16 : i32
    %40 = vector.broadcast %c16_i32_16 : i32 to vector<30x8xi32>
    %41 = arith.cmpi slt, %37, %40 : vector<30x8xi32>
    %42 = arith.andi %39, %41 : vector<30x8xi1>
    %cst_17 = arith.constant 0.000000e+00 : f32
    %43 = vector.broadcast %cst_17 : f32 to vector<30x8xf32>
    %44 = arith.select %42, %33, %43 : vector<30x8xi1>, vector<30x8xf32>
    %c0_18 = arith.constant 0 : index
    %c0_19 = arith.constant 0 : index
    %45 = vector.load %arg8[%c0_18, %c0_19] : memref<8x24xf32, #tpu.memory_space<vmem>>, vector<8x24xf32>
    %c0_20 = arith.constant 0 : index
    %c0_21 = arith.constant 0 : index
    %46 = vector.load %arg9[%c0_20, %c0_21] : memref<1x8xf32, #tpu.memory_space<vmem>>, vector<1x8xf32>
    %c0_22 = arith.constant 0 : index
    %c0_23 = arith.constant 0 : index
    %47 = vector.load %arg10[%c0_22, %c0_23] : memref<8x8xf32, #tpu.memory_space<vmem>>, vector<8x8xf32>
    %c0_24 = arith.constant 0 : index
    %c0_25 = arith.constant 0 : index
    %48 = vector.load %arg11[%c0_24, %c0_25] : memref<1x8xf32, #tpu.memory_space<vmem>>, vector<1x8xf32>
    %cst_26 = arith.constant dense<0.000000e+00> : vector<30x24xf32>
    %49 = tpu.matmul %44, %45, %cst_26 {dimension_numbers = #tpu.dot_dimension_numbers<[1], [0], [0], [1], [0, 0, 1, 1], [], []>} : vector<30x8xf32>, vector<8x24xf32>, vector<30x24xf32> -> vector<30x24xf32>
    %50 = vector.extract_strided_slice %49 {offsets = [0, 0], sizes = [28, 8], strides = [1, 1]} : vector<30x24xf32> to vector<28x8xf32>
    %51 = vector.extract_strided_slice %49 {offsets = [1, 8], sizes = [28, 8], strides = [1, 1]} : vector<30x24xf32> to vector<28x8xf32>
    %52 = arith.addf %50, %51 : vector<28x8xf32>
    %53 = vector.extract_strided_slice %49 {offsets = [2, 16], sizes = [28, 8], strides = [1, 1]} : vector<30x24xf32> to vector<28x8xf32>
    %54 = arith.addf %52, %53 : vector<28x8xf32>
    %55 = vector.broadcast %46 : vector<1x8xf32> to vector<28x8xf32>
    %56 = arith.addf %54, %55 : vector<28x8xf32>
    %cst_27 = arith.constant dense<0.000000e+00> : vector<28x8xf32>
    %57 = tpu.matmul %56, %47, %cst_27 {dimension_numbers = #tpu.dot_dimension_numbers<[1], [0], [0], [1], [0, 0, 1, 1], [], []>} : vector<28x8xf32>, vector<8x8xf32>, vector<28x8xf32> -> vector<28x8xf32>
    %58 = vector.broadcast %48 : vector<1x8xf32> to vector<28x8xf32>
    %59 = arith.addf %57, %58 : vector<28x8xf32>
    %60 = vector.extract_strided_slice %44 {offsets = [1, 0], sizes = [28, 8], strides = [1, 1]} : vector<30x8xf32> to vector<28x8xf32>
    %61 = arith.addf %59, %60 : vector<28x8xf32>
    %cst_28 = arith.constant 0.000000e+00 : f32
    %62 = vector.broadcast %cst_28 : f32 to vector<28x8xf32>
    %63 = arith.cmpf ogt, %61, %62 : vector<28x8xf32>
    %cst_29 = arith.constant 2.000000e-01 : f32
    %64 = vector.broadcast %cst_29 : f32 to vector<28x8xf32>
    %65 = arith.mulf %64, %61 : vector<28x8xf32>
    %66 = arith.select %63, %61, %65 : vector<28x8xi1>, vector<28x8xf32>
    %c6_i32 = arith.constant 6 : i32
    %67 = arith.subi %0, %c6_i32 : i32
    %68 = tpu.iota {dimensions = array<i32: 0>} : vector<28x8xi32>
    %69 = vector.broadcast %67 : i32 to vector<28x8xi32>
    %70 = arith.addi %69, %68 : vector<28x8xi32>
    %c0_i32_30 = arith.constant 0 : i32
    %71 = vector.broadcast %c0_i32_30 : i32 to vector<28x8xi32>
    %72 = arith.cmpi sge, %70, %71 : vector<28x8xi32>
    %c16_i32_31 = arith.constant 16 : i32
    %73 = vector.broadcast %c16_i32_31 : i32 to vector<28x8xi32>
    %74 = arith.cmpi slt, %70, %73 : vector<28x8xi32>
    %75 = arith.andi %72, %74 : vector<28x8xi1>
    %cst_32 = arith.constant 0.000000e+00 : f32
    %76 = vector.broadcast %cst_32 : f32 to vector<28x8xf32>
    %77 = arith.select %75, %66, %76 : vector<28x8xi1>, vector<28x8xf32>
    %c0_33 = arith.constant 0 : index
    %c0_34 = arith.constant 0 : index
    %78 = vector.load %arg12[%c0_33, %c0_34] : memref<8x24xf32, #tpu.memory_space<vmem>>, vector<8x24xf32>
    %c0_35 = arith.constant 0 : index
    %c0_36 = arith.constant 0 : index
    %79 = vector.load %arg13[%c0_35, %c0_36] : memref<1x8xf32, #tpu.memory_space<vmem>>, vector<1x8xf32>
    %c0_37 = arith.constant 0 : index
    %c0_38 = arith.constant 0 : index
    %80 = vector.load %arg14[%c0_37, %c0_38] : memref<8x8xf32, #tpu.memory_space<vmem>>, vector<8x8xf32>
    %c0_39 = arith.constant 0 : index
    %c0_40 = arith.constant 0 : index
    %81 = vector.load %arg15[%c0_39, %c0_40] : memref<1x8xf32, #tpu.memory_space<vmem>>, vector<1x8xf32>
    %cst_41 = arith.constant dense<0.000000e+00> : vector<28x24xf32>
    %82 = tpu.matmul %77, %78, %cst_41 {dimension_numbers = #tpu.dot_dimension_numbers<[1], [0], [0], [1], [0, 0, 1, 1], [], []>} : vector<28x8xf32>, vector<8x24xf32>, vector<28x24xf32> -> vector<28x24xf32>
    %83 = vector.extract_strided_slice %82 {offsets = [0, 0], sizes = [22, 8], strides = [1, 1]} : vector<28x24xf32> to vector<22x8xf32>
    %84 = vector.extract_strided_slice %82 {offsets = [3, 8], sizes = [22, 8], strides = [1, 1]} : vector<28x24xf32> to vector<22x8xf32>
    %85 = arith.addf %83, %84 : vector<22x8xf32>
    %86 = vector.extract_strided_slice %82 {offsets = [6, 16], sizes = [22, 8], strides = [1, 1]} : vector<28x24xf32> to vector<22x8xf32>
    %87 = arith.addf %85, %86 : vector<22x8xf32>
    %88 = vector.broadcast %79 : vector<1x8xf32> to vector<22x8xf32>
    %89 = arith.addf %87, %88 : vector<22x8xf32>
    %cst_42 = arith.constant dense<0.000000e+00> : vector<22x8xf32>
    %90 = tpu.matmul %89, %80, %cst_42 {dimension_numbers = #tpu.dot_dimension_numbers<[1], [0], [0], [1], [0, 0, 1, 1], [], []>} : vector<22x8xf32>, vector<8x8xf32>, vector<22x8xf32> -> vector<22x8xf32>
    %91 = vector.broadcast %81 : vector<1x8xf32> to vector<22x8xf32>
    %92 = arith.addf %90, %91 : vector<22x8xf32>
    %93 = vector.extract_strided_slice %77 {offsets = [3, 0], sizes = [22, 8], strides = [1, 1]} : vector<28x8xf32> to vector<22x8xf32>
    %94 = arith.addf %92, %93 : vector<22x8xf32>
    %cst_43 = arith.constant 0.000000e+00 : f32
    %95 = vector.broadcast %cst_43 : f32 to vector<22x8xf32>
    %96 = arith.cmpf ogt, %94, %95 : vector<22x8xf32>
    %cst_44 = arith.constant 2.000000e-01 : f32
    %97 = vector.broadcast %cst_44 : f32 to vector<22x8xf32>
    %98 = arith.mulf %97, %94 : vector<22x8xf32>
    %99 = arith.select %96, %94, %98 : vector<22x8xi1>, vector<22x8xf32>
    %c3_i32 = arith.constant 3 : i32
    %100 = arith.subi %0, %c3_i32 : i32
    %101 = tpu.iota {dimensions = array<i32: 0>} : vector<22x8xi32>
    %102 = vector.broadcast %100 : i32 to vector<22x8xi32>
    %103 = arith.addi %102, %101 : vector<22x8xi32>
    %c0_i32_45 = arith.constant 0 : i32
    %104 = vector.broadcast %c0_i32_45 : i32 to vector<22x8xi32>
    %105 = arith.cmpi sge, %103, %104 : vector<22x8xi32>
    %c16_i32_46 = arith.constant 16 : i32
    %106 = vector.broadcast %c16_i32_46 : i32 to vector<22x8xi32>
    %107 = arith.cmpi slt, %103, %106 : vector<22x8xi32>
    %108 = arith.andi %105, %107 : vector<22x8xi1>
    %cst_47 = arith.constant 0.000000e+00 : f32
    %109 = vector.broadcast %cst_47 : f32 to vector<22x8xf32>
    %110 = arith.select %108, %99, %109 : vector<22x8xi1>, vector<22x8xf32>
    %c0_48 = arith.constant 0 : index
    %c0_49 = arith.constant 0 : index
    %111 = vector.load %arg22[%c0_48, %c0_49] : memref<24x8xf32, #tpu.memory_space<vmem>>, vector<22x8xf32>
    tpu.vector_store %arg22[%c0_48, %c0_49], %110 {strides = array<i32>} : memref<24x8xf32, #tpu.memory_space<vmem>>, vector<22x8xf32>,
    %c0_50 = arith.constant 0 : index
    %c0_51 = arith.constant 0 : index
    %c0_52 = arith.constant 0 : index
    %112 = vector.load %arg5[%c0_50, %c0_51, %c0_52] : memref<1x1x33xf32, #tpu.memory_space<vmem>>, vector<1x1x33xf32>
    %113 = vector.shape_cast %112 : vector<1x1x33xf32> to vector<1x33xf32>
    %c0_53 = arith.constant 0 : index
    %c0_54 = arith.constant 0 : index
    %114 = vector.load %arg17[%c0_53, %c0_54] : memref<33x8xf32, #tpu.memory_space<vmem>>, vector<33x8xf32>
    %cst_55 = arith.constant dense<0.000000e+00> : vector<1x8xf32>
    %115 = tpu.matmul %113, %114, %cst_55 {dimension_numbers = #tpu.dot_dimension_numbers<[1], [0], [0], [1], [0, 0, 1, 1], [], []>} : vector<1x33xf32>, vector<33x8xf32>, vector<1x8xf32> -> vector<1x8xf32>
    %c0_56 = arith.constant 0 : index
    %c0_57 = arith.constant 0 : index
    %116 = vector.load %arg18[%c0_56, %c0_57] : memref<33x8xf32, #tpu.memory_space<vmem>>, vector<33x8xf32>
    %cst_58 = arith.constant dense<0.000000e+00> : vector<1x8xf32>
    %117 = tpu.matmul %113, %116, %cst_58 {dimension_numbers = #tpu.dot_dimension_numbers<[1], [0], [0], [1], [0, 0, 1, 1], [], []>} : vector<1x33xf32>, vector<33x8xf32>, vector<1x8xf32> -> vector<1x8xf32>
    %118 = tpu.iota {dimensions = array<i32: 0>} : vector<4x8xi32>
    %c0_i32_59 = arith.constant 0 : i32
    %119 = vector.broadcast %c0_i32_59 : i32 to vector<4x8xi32>
    %120 = arith.cmpi eq, %118, %119 : vector<4x8xi32>
    %c0_i32_60 = arith.constant 0 : i32
    %121 = arith.cmpi eq, %arg1, %c0_i32_60 : i32
    %122 = vector.broadcast %121 : i1 to vector<4x8xi1>
    %123 = arith.andi %120, %122 : vector<4x8xi1>
    %124 = vector.shape_cast %117 : vector<1x8xf32> to vector<1x8xf32>
    %125 = vector.broadcast %124 : vector<1x8xf32> to vector<4x8xf32>
    %126 = vector.shape_cast %115 : vector<1x8xf32> to vector<1x8xf32>
    %127 = vector.broadcast %126 : vector<1x8xf32> to vector<4x8xf32>
    %128 = arith.select %123, %125, %127 : vector<4x8xi1>, vector<4x8xf32>
    %c0_61 = arith.constant 0 : index
    %c0_62 = arith.constant 0 : index
    %129 = vector.load %arg19[%c0_61, %c0_62] : memref<1x8xf32, #tpu.memory_space<vmem>>, vector<1x8xf32>
    %130 = vector.broadcast %129 : vector<1x8xf32> to vector<4x8xf32>
    %131 = arith.addf %128, %130 : vector<4x8xf32>
    %c0_63 = arith.constant 0 : index
    %c0_64 = arith.constant 0 : index
    %132 = tpu.strided_load %arg22[%c0_63, %c0_64] {strides = array<i32: 4, 1>} : memref<24x8xf32, #tpu.memory_space<vmem>>, vector<4x8xf32>
    %c0_65 = arith.constant 0 : index
    %c0_66 = arith.constant 0 : index
    %133 = vector.load %arg16[%c0_65, %c0_66] : memref<56x8xf32, #tpu.memory_space<vmem>>, vector<8x8xf32>
    %cst_67 = arith.constant dense<0.000000e+00> : vector<4x8xf32>
    %134 = tpu.matmul %132, %133, %cst_67 {dimension_numbers = #tpu.dot_dimension_numbers<[1], [0], [0], [1], [0, 0, 1, 1], [], []>} : vector<4x8xf32>, vector<8x8xf32>, vector<4x8xf32> -> vector<4x8xf32>
    %135 = arith.addf %131, %134 : vector<4x8xf32>
    %c1 = arith.constant 1 : index
    %c0_68 = arith.constant 0 : index
    %136 = tpu.strided_load %arg22[%c1, %c0_68] {strides = array<i32: 4, 1>} : memref<24x8xf32, #tpu.memory_space<vmem>>, vector<4x8xf32>
    %c8 = arith.constant 8 : index
    %c0_69 = arith.constant 0 : index
    %137 = vector.load %arg16[%c8, %c0_69] : memref<56x8xf32, #tpu.memory_space<vmem>>, vector<8x8xf32>
    %cst_70 = arith.constant dense<0.000000e+00> : vector<4x8xf32>
    %138 = tpu.matmul %136, %137, %cst_70 {dimension_numbers = #tpu.dot_dimension_numbers<[1], [0], [0], [1], [0, 0, 1, 1], [], []>} : vector<4x8xf32>, vector<8x8xf32>, vector<4x8xf32> -> vector<4x8xf32>
    %139 = arith.addf %135, %138 : vector<4x8xf32>
    %c2 = arith.constant 2 : index
    %c0_71 = arith.constant 0 : index
    %140 = tpu.strided_load %arg22[%c2, %c0_71] {strides = array<i32: 4, 1>} : memref<24x8xf32, #tpu.memory_space<vmem>>, vector<4x8xf32>
    %c16 = arith.constant 16 : index
    %c0_72 = arith.constant 0 : index
    %141 = vector.load %arg16[%c16, %c0_72] : memref<56x8xf32, #tpu.memory_space<vmem>>, vector<8x8xf32>
    %cst_73 = arith.constant dense<0.000000e+00> : vector<4x8xf32>
    %142 = tpu.matmul %140, %141, %cst_73 {dimension_numbers = #tpu.dot_dimension_numbers<[1], [0], [0], [1], [0, 0, 1, 1], [], []>} : vector<4x8xf32>, vector<8x8xf32>, vector<4x8xf32> -> vector<4x8xf32>
    %143 = arith.addf %139, %142 : vector<4x8xf32>
    %c3 = arith.constant 3 : index
    %c0_74 = arith.constant 0 : index
    %144 = tpu.strided_load %arg22[%c3, %c0_74] {strides = array<i32: 4, 1>} : memref<24x8xf32, #tpu.memory_space<vmem>>, vector<4x8xf32>
    %c24 = arith.constant 24 : index
    %c0_75 = arith.constant 0 : index
    %145 = vector.load %arg16[%c24, %c0_75] : memref<56x8xf32, #tpu.memory_space<vmem>>, vector<8x8xf32>
    %cst_76 = arith.constant dense<0.000000e+00> : vector<4x8xf32>
    %146 = tpu.matmul %144, %145, %cst_76 {dimension_numbers = #tpu.dot_dimension_numbers<[1], [0], [0], [1], [0, 0, 1, 1], [], []>} : vector<4x8xf32>, vector<8x8xf32>, vector<4x8xf32> -> vector<4x8xf32>
    %147 = arith.addf %143, %146 : vector<4x8xf32>
    %c4 = arith.constant 4 : index
    %c0_77 = arith.constant 0 : index
    %148 = tpu.strided_load %arg22[%c4, %c0_77] {strides = array<i32: 4, 1>} : memref<24x8xf32, #tpu.memory_space<vmem>>, vector<4x8xf32>
    %c32 = arith.constant 32 : index
    %c0_78 = arith.constant 0 : index
    %149 = vector.load %arg16[%c32, %c0_78] : memref<56x8xf32, #tpu.memory_space<vmem>>, vector<8x8xf32>
    %cst_79 = arith.constant dense<0.000000e+00> : vector<4x8xf32>
    %150 = tpu.matmul %148, %149, %cst_79 {dimension_numbers = #tpu.dot_dimension_numbers<[1], [0], [0], [1], [0, 0, 1, 1], [], []>} : vector<4x8xf32>, vector<8x8xf32>, vector<4x8xf32> -> vector<4x8xf32>
    %151 = arith.addf %147, %150 : vector<4x8xf32>
    %c5 = arith.constant 5 : index
    %c0_80 = arith.constant 0 : index
    %152 = tpu.strided_load %arg22[%c5, %c0_80] {strides = array<i32: 4, 1>} : memref<24x8xf32, #tpu.memory_space<vmem>>, vector<4x8xf32>
    %c40 = arith.constant 40 : index
    %c0_81 = arith.constant 0 : index
    %153 = vector.load %arg16[%c40, %c0_81] : memref<56x8xf32, #tpu.memory_space<vmem>>, vector<8x8xf32>
    %cst_82 = arith.constant dense<0.000000e+00> : vector<4x8xf32>
    %154 = tpu.matmul %152, %153, %cst_82 {dimension_numbers = #tpu.dot_dimension_numbers<[1], [0], [0], [1], [0, 0, 1, 1], [], []>} : vector<4x8xf32>, vector<8x8xf32>, vector<4x8xf32> -> vector<4x8xf32>
    %155 = arith.addf %151, %154 : vector<4x8xf32>
    %c6 = arith.constant 6 : index
    %c0_83 = arith.constant 0 : index
    %156 = tpu.strided_load %arg22[%c6, %c0_83] {strides = array<i32: 4, 1>} : memref<24x8xf32, #tpu.memory_space<vmem>>, vector<4x8xf32>
    %c48 = arith.constant 48 : index
    %c0_84 = arith.constant 0 : index
    %157 = vector.load %arg16[%c48, %c0_84] : memref<56x8xf32, #tpu.memory_space<vmem>>, vector<8x8xf32>
    %cst_85 = arith.constant dense<0.000000e+00> : vector<4x8xf32>
    %158 = tpu.matmul %156, %157, %cst_85 {dimension_numbers = #tpu.dot_dimension_numbers<[1], [0], [0], [1], [0, 0, 1, 1], [], []>} : vector<4x8xf32>, vector<8x8xf32>, vector<4x8xf32> -> vector<4x8xf32>
    %159 = arith.addf %155, %158 : vector<4x8xf32>
    %cst_86 = arith.constant 0.000000e+00 : f32
    %160 = vector.broadcast %cst_86 : f32 to vector<4x8xf32>
    %161 = arith.cmpf ogt, %159, %160 : vector<4x8xf32>
    %cst_87 = arith.constant 2.000000e-01 : f32
    %162 = vector.broadcast %cst_87 : f32 to vector<4x8xf32>
    %163 = arith.mulf %162, %159 : vector<4x8xf32>
    %164 = arith.select %161, %159, %163 : vector<4x8xi1>, vector<4x8xf32>
    %165 = tpu.transpose %164, [1, 0] : vector<4x8xf32> -> vector<8x4xf32>
    %c0_88 = arith.constant 0 : index
    %c0_89 = arith.constant 0 : index
    %c0_90 = arith.constant 0 : index
    %166 = vector.load %arg20[%c0_88, %c0_89, %c0_90] : memref<1x8x4xf32, #tpu.memory_space<vmem>>, vector<1x8x4xf32>
    %167 = vector.shape_cast %166 : vector<1x8x4xf32> to vector<8x4xf32>
    %168 = vector.shape_cast %165 : vector<8x4xf32> to vector<1x8x4xf32>
    tpu.vector_store %arg20[%c0_88, %c0_89, %c0_90], %168 {strides = array<i32>} : memref<1x8x4xf32, #tpu.memory_space<vmem>>, vector<1x8x4xf32>,
    %169 = tpu.iota {dimensions = array<i32: 1>} : vector<1x128xi32>
    %c0_i32_91 = arith.constant 0 : i32
    %170 = vector.broadcast %c0_i32_91 : i32 to vector<1x128xi32>
    %171 = arith.cmpi eq, %169, %170 : vector<1x128xi32>
    %172 = vector.shape_cast %164 : vector<4x8xf32> to vector<1x4x8xf32>
    %cst_92 = arith.constant dense<0.000000e+00> : vector<1xf32>
    %173 = vector.multi_reduction <add>, %172, %cst_92 [1, 2] : vector<1x4x8xf32> to vector<1xf32>
    %174 = vector.shape_cast %173 : vector<1xf32> to vector<1x1x1xf32>
    %175 = vector.extract %174[0, 0, 0] : f32 from vector<1x1x1xf32>
    %cst_93 = arith.constant 0.000000e+00 : f32
    %176 = vector.broadcast %175 : f32 to vector<1x128xf32>
    %177 = vector.broadcast %cst_93 : f32 to vector<1x128xf32>
    %178 = arith.select %171, %176, %177 : vector<1x128xi1>, vector<1x128xf32>
    %c1_i32 = arith.constant 1 : i32
    %179 = vector.broadcast %c1_i32 : i32 to vector<1x128xi32>
    %180 = arith.cmpi eq, %169, %179 : vector<1x128xi32>
    %181 = arith.mulf %164, %164 : vector<4x8xf32>
    %182 = vector.shape_cast %181 : vector<4x8xf32> to vector<1x4x8xf32>
    %cst_94 = arith.constant dense<0.000000e+00> : vector<1xf32>
    %183 = vector.multi_reduction <add>, %182, %cst_94 [1, 2] : vector<1x4x8xf32> to vector<1xf32>
    %184 = vector.shape_cast %183 : vector<1xf32> to vector<1x1x1xf32>
    %185 = vector.extract %184[0, 0, 0] : f32 from vector<1x1x1xf32>
    %cst_95 = arith.constant 0.000000e+00 : f32
    %186 = vector.broadcast %185 : f32 to vector<1x128xf32>
    %187 = vector.broadcast %cst_95 : f32 to vector<1x128xf32>
    %188 = arith.select %180, %186, %187 : vector<1x128xi1>, vector<1x128xf32>
    %189 = arith.addf %178, %188 : vector<1x128xf32>
    %c0_i32_96 = arith.constant 0 : i32
    %190 = arith.cmpi eq, %arg1, %c0_i32_96 : i32
    %191 = arith.extui %190 : i1 to i32
    %c0_i32_97 = arith.constant 0 : i32
    %192 = arith.cmpi ne, %191, %c0_i32_97 : i32
    scf.if %192 {
      %cst_104 = arith.constant 0.000000e+00 : f32
      %199 = vector.broadcast %cst_104 : f32 to vector<1x1x128xf32>
      %c0_105 = arith.constant 0 : index
      %c0_106 = arith.constant 0 : index
      %c0_107 = arith.constant 0 : index
      %200 = vector.load %arg21[%c0_105, %c0_106, %c0_107] : memref<1x1x128xf32, #tpu.memory_space<vmem>>, vector<1x1x128xf32>
      tpu.vector_store %arg21[%c0_105, %c0_106, %c0_107], %199 {strides = array<i32>} : memref<1x1x128xf32, #tpu.memory_space<vmem>>, vector<1x1x128xf32>,
    } else {
    }
    %c0_98 = arith.constant 0 : index
    %c0_99 = arith.constant 0 : index
    %c0_100 = arith.constant 0 : index
    %193 = vector.load %arg21[%c0_98, %c0_99, %c0_100] : memref<1x1x128xf32, #tpu.memory_space<vmem>>, vector<1x1x128xf32>
    %194 = vector.shape_cast %193 : vector<1x1x128xf32> to vector<1x128xf32>
    %195 = arith.addf %194, %189 : vector<1x128xf32>
    %c0_101 = arith.constant 0 : index
    %c0_102 = arith.constant 0 : index
    %c0_103 = arith.constant 0 : index
    %196 = vector.load %arg21[%c0_101, %c0_102, %c0_103] : memref<1x1x128xf32, #tpu.memory_space<vmem>>, vector<1x1x128xf32>
    %197 = vector.shape_cast %196 : vector<1x1x128xf32> to vector<1x128xf32>
    %198 = vector.shape_cast %195 : vector<1x128xf32> to vector<1x1x128xf32>
    tpu.vector_store %arg21[%c0_101, %c0_102, %c0_103], %198 {strides = array<i32>} : memref<1x1x128xf32, #tpu.memory_space<vmem>>, vector<1x1x128xf32>,
    return
  }
  func.func @transform_0(%arg0: i32, %arg1: i32) -> (i32, i32, i32) {
    %c0_i32 = arith.constant 0 : i32
    %c0_i32_0 = arith.constant 0 : i32
    return %arg0, %c0_i32, %arg1 : i32, i32, i32
  }
  func.func @transform_1(%arg0: i32, %arg1: i32) -> (i32, i32, i32, i32) {
    %c0_i32 = arith.constant 0 : i32
    %c0_i32_0 = arith.constant 0 : i32
    %c0_i32_1 = arith.constant 0 : i32
    return %arg0, %arg1, %c0_i32, %c0_i32_0 : i32, i32, i32, i32
  }
  func.func @transform_2(%arg0: i32, %arg1: i32) -> (i32, i32, i32, i32) {
    %c0_i32 = arith.constant 0 : i32
    %c0_i32_0 = arith.constant 0 : i32
    %c0_i32_1 = arith.constant 0 : i32
    return %arg0, %arg1, %c0_i32, %c0_i32_0 : i32, i32, i32, i32
  }
  func.func @transform_3(%arg0: i32, %arg1: i32) -> (i32, i32, i32) {
    %c0_i32 = arith.constant 0 : i32
    %c0_i32_0 = arith.constant 0 : i32
    %c0_i32_1 = arith.constant 0 : i32
    return %arg0, %c0_i32, %c0_i32_0 : i32, i32, i32
  }
  func.func @transform_4(%arg0: i32, %arg1: i32) -> (i32, i32) {
    %c0_i32 = arith.constant 0 : i32
    %c0_i32_0 = arith.constant 0 : i32
    %c0_i32_1 = arith.constant 0 : i32
    return %c0_i32, %c0_i32_0 : i32, i32
  }
  func.func @transform_5(%arg0: i32, %arg1: i32) -> (i32, i32) {
    %c0_i32 = arith.constant 0 : i32
    %c0_i32_0 = arith.constant 0 : i32
    %c0_i32_1 = arith.constant 0 : i32
    return %c0_i32, %c0_i32_0 : i32, i32
  }
  func.func @transform_6(%arg0: i32, %arg1: i32) -> (i32, i32) {
    %c0_i32 = arith.constant 0 : i32
    %c0_i32_0 = arith.constant 0 : i32
    %c0_i32_1 = arith.constant 0 : i32
    return %c0_i32, %c0_i32_0 : i32, i32
  }
  func.func @transform_7(%arg0: i32, %arg1: i32) -> (i32, i32) {
    %c0_i32 = arith.constant 0 : i32
    %c0_i32_0 = arith.constant 0 : i32
    %c0_i32_1 = arith.constant 0 : i32
    return %c0_i32, %c0_i32_0 : i32, i32
  }
  func.func @transform_8(%arg0: i32, %arg1: i32) -> (i32, i32) {
    %c0_i32 = arith.constant 0 : i32
    %c0_i32_0 = arith.constant 0 : i32
    %c0_i32_1 = arith.constant 0 : i32
    return %c0_i32, %c0_i32_0 : i32, i32
  }
  func.func @transform_9(%arg0: i32, %arg1: i32) -> (i32, i32) {
    %c0_i32 = arith.constant 0 : i32
    %c0_i32_0 = arith.constant 0 : i32
    %c0_i32_1 = arith.constant 0 : i32
    return %c0_i32, %c0_i32_0 : i32, i32
  }
  func.func @transform_10(%arg0: i32, %arg1: i32) -> (i32, i32) {
    %c0_i32 = arith.constant 0 : i32
    %c0_i32_0 = arith.constant 0 : i32
    %c0_i32_1 = arith.constant 0 : i32
    return %c0_i32, %c0_i32_0 : i32, i32
  }
  func.func @transform_11(%arg0: i32, %arg1: i32) -> (i32, i32) {
    %c0_i32 = arith.constant 0 : i32
    %c0_i32_0 = arith.constant 0 : i32
    %c0_i32_1 = arith.constant 0 : i32
    return %c0_i32, %c0_i32_0 : i32, i32
  }
  func.func @transform_12(%arg0: i32, %arg1: i32) -> (i32, i32) {
    %c0_i32 = arith.constant 0 : i32
    %c0_i32_0 = arith.constant 0 : i32
    %c0_i32_1 = arith.constant 0 : i32
    return %c0_i32, %c0_i32_0 : i32, i32
  }
  func.func @transform_13(%arg0: i32, %arg1: i32) -> (i32, i32) {
    %c0_i32 = arith.constant 0 : i32
    %c0_i32_0 = arith.constant 0 : i32
    %c0_i32_1 = arith.constant 0 : i32
    return %c0_i32, %c0_i32_0 : i32, i32
  }
  func.func @transform_14(%arg0: i32, %arg1: i32) -> (i32, i32) {
    %c0_i32 = arith.constant 0 : i32
    %c0_i32_0 = arith.constant 0 : i32
    %c0_i32_1 = arith.constant 0 : i32
    return %c0_i32, %c0_i32_0 : i32, i32
  }
  func.func @transform_15(%arg0: i32, %arg1: i32) -> (i32, i32) {
    %c0_i32 = arith.constant 0 : i32
    %c0_i32_0 = arith.constant 0 : i32
    %c0_i32_1 = arith.constant 0 : i32
    return %c0_i32, %c0_i32_0 : i32, i32
  }
  func.func @transform_16(%arg0: i32, %arg1: i32) -> (i32, i32) {
    %c0_i32 = arith.constant 0 : i32
    %c0_i32_0 = arith.constant 0 : i32
    %c0_i32_1 = arith.constant 0 : i32
    return %c0_i32, %c0_i32_0 : i32, i32
  }
  func.func @transform_17(%arg0: i32, %arg1: i32) -> (i32, i32) {
    %c0_i32 = arith.constant 0 : i32
    %c0_i32_0 = arith.constant 0 : i32
    %c0_i32_1 = arith.constant 0 : i32
    return %c0_i32, %c0_i32_0 : i32, i32
  }
  func.func @transform_18(%arg0: i32, %arg1: i32) -> (i32, i32, i32) {
    %c0_i32 = arith.constant 0 : i32
    %c0_i32_0 = arith.constant 0 : i32
    return %arg0, %c0_i32, %arg1 : i32, i32, i32
  }
  func.func @transform_19(%arg0: i32, %arg1: i32) -> (i32, i32, i32) {
    %c0_i32 = arith.constant 0 : i32
    %c0_i32_0 = arith.constant 0 : i32
    %c0_i32_1 = arith.constant 0 : i32
    return %arg0, %c0_i32, %c0_i32_0 : i32, i32, i32
  }
}

</mosaic_0001>

<bundles_post_ra>
// kernel: downsampling_block.3
= control target key start
LH: loop header
LB: loop body
LE: loop exit
PB: predicated region body
PF: predicated region fallthrough
CT: control target
= control target key end

     0   :  { %s394_s9 = smov 0   ;;  %s396_s10 = smov 0   ;;  %s434_s0 = inlined_call_operand.vmem [shape: f32[2,8,4], index: 0, kind: input, shape index: {}, may-alias: {0,2}]   ;;  %s435_s1 = inlined_call_operand.vmem [shape: f32[2,1,128], index: 1, kind: input, shape index: {}]   ;;  %s436_s2 = inlined_call_operand.vmem [shape: f32[2,8,4], index: 2, kind: output, shape index: {}, may-alias: {0,2}]  }
   0x1   :  { %s398_s11 = smov 0  }
   0x2 LB: > { %s24_s12 = sadd.s32 1, %s373_s10  ;;  %p318_p0 = scmp.ge.s32.totalorder %s377_s11, 1  ;;  %s377_s11 = sphi %s398_s11, %s12_s11   ;;  %s373_s10 = sphi %s396_s10, %s438_s10   ;;  %s369_s9 = sphi %s394_s9, %s437_s9  }
   0x3   : > { %p26_p1 = scmp.ge.s32.totalorder %s24_s12, 2  ;;  %p138_p2 = scmp.lt.s32.totalorder %s377_s11, 3 }
   0x5   : > { %s440_s12 = smov (%p26_p1, %s24_s12), 0  ;;  %p139_p3 = pnand %p318_p0, %p138_p2 }
   0x6   : > { %p167_p4 = scmp.lt.s32.totalorder (!%p139_p3), %s369_s9, 1  ;;  %v185_v0 = vlaneseq (!%p139_p3)  ;;  %vm189_vm1 = vcmask (!%p139_p3), 1040384   ;;  %vm229_vm3 = vcmask (!%p139_p3), 31744  }
   0x7   : > { %142 = sbr.rel (%p139_p3) target bundleno = 299 (0x12b), region = 28 }
   0x8   : > { %v186_v1 = vand.u32 (!%p139_p3), 127, %v185_v0 }
   0xa   : > { %vm187_vm0 = vcmp.eq.s32.totalorder (!%p139_p3), %v186_v1, 0  ;;  %vm200_vm2 = vcmp.eq.s32.totalorder (!%p139_p3), %v186_v1, 1 }
   0xe   : > { %s442_s9 = smov (!%p167_p4, %s369_s9), 1 }
   0xf   : > { %s176_s15 = scalar_lea.vmem %s435_s1, %s442_s9  ;;  %s319_s23 = sshll.u32 %s442_s9, 3 }
  0x10   : > { %v184_v2 = vld [vmem:[%s176_s15] sm:$0x1]  ;;  %s173_s26 = scalar_lea.vmem %s434_s0, %s319_s23  ;;  %s183_s30 = scalar_lea.vmem %s436_s2, %s319_s23 }
  0x11   : > { %v188_v3 = vsel %vm187_vm0, %v184_v2, 0.0  ;;  %v201_v4 = vsel %vm200_vm2, %v184_v2, 0.0  ;;  %v224_v24 = vld [vmem:[%s173_s26] sm:$0xff] }
  0x12   : > { %v190_v5 = vsel %vm189_vm1, %v188_v3, 0.0  ;;  %v202_v6 = vsel %vm189_vm1, %v201_v4, 0.0 }
  0x13   : > { %191 = vadd.xlane.f32.xlu0 %v190_v5 }
  0x17   : > { %203 = vadd.xlane.f32.xlu0 %v202_v6 }
  0xa0   : > { %v192_v7 = vpop.xlane.xlu0 %191 }
  0xa1   : > { %v193_v8 = vrot.slane %v192_v7, 4 }
  0xa3   : > { %v194_v9 = vadd.f32 %v193_v8, %v192_v7 }
  0xa4   : > { %v204_v10 = vpop.xlane.xlu0 %203 }
  0xa5   : > { %v195_v11 = vrot.slane %v194_v9, 2  ;;  %v205_v12 = vrot.slane %v204_v10, 4 }
  0xa7   : > { %v206_v13 = vadd.f32 %v205_v12, %v204_v10  ;;  %v196_v14 = vadd.f32 %v195_v11, %v194_v9 }
  0xa9   : > { %v207_v15 = vrot.slane %v206_v13, 2  ;;  %v197_v16 = vrot.slane %v196_v14, 1 }
  0xab   : > { %v208_v17 = vadd.f32 %v207_v15, %v206_v13  ;;  %v198_v18 = vadd.f32 %v197_v16, %v196_v14 }
  0xad   : > { %323 = vpush %v198_v18  ;;  %v209_v19 = vrot.slane %v208_v17, 1 }
  0xaf   : > { %v210_v20 = vadd.f32 %v209_v19, %v208_v17 }
  0xb1   : > { %325 = vpush %v210_v20 }
  0xde   : > { %s324_s16 = spop %323 }
  0xdf   : > { %s214_s17 = smul.f32 0.03125, %s324_s16 }
  0xe1   : > { %s218_s18 = smul.f32 %s214_s17, %s214_s17  ;;  %v225_v23 = vstv %s214_s17 }
  0xe2   : > { %s326_s19 = spop %325  ;;  %v226_v25 = vsub.f32 %v224_v24, %v225_v23 }
  0xe3   : > { %s217_s20 = smul.f32 0.03125, %s326_s19 }
  0xe5   : > { %s219_s21 = ssub.f32 %s217_s20, %s218_s18 }
  0xe7   : > { %s220_s22 = sadd.f32 1e-05, %s219_s21 }
  0xe9   : > { %v221_v21 = vstv %s220_s22 }
  0xea   : > { %353 = vrsqrt.f32 %v221_v21 }
  0xf4   : > { %v354_v22 = vpop.eup %353 }
  0xf5   : > { %327 = vpush %v354_v22 }
 0x126   : > { %s328_s27 = spop %327 }
 0x127   : > { %v227_v26 = vstv %s328_s27 }
 0x128   : > { %v228_v27 = vmul.f32 %v227_v26, %v226_v25 }
 0x12a   : > { %230 = vst.msk [vmem:[%s183_s30] sm:$0xff] %vm229_vm3, %v228_v27 }
 0x12b PF: > { %s12_s11 = sadd.s32 1, %s377_s11   ;;  %s437_s9 = smov %s373_s10 }
 0x12c   : > { %p9_p5 = scmp.ge.s32.totalorder %s12_s11, 4   ;;  %s438_s10 = smov %s440_s12 }
 0x12e   :  { %11 = sbr.rel (!%p9_p5) target bundleno = 2 (0x2), region = 61 }

// kernel: downsampling_block.2
= control target key start
LH: loop header
LB: loop body
LE: loop exit
PB: predicated region body
PF: predicated region fallthrough
CT: control target
= control target key end

     0   :  { %s3121_s30 = smov 0   ;;  %s3123_s20 = smov 0   ;;  %s3477_s0 = inlined_call_operand.vmem [shape: f32[2,4,16], index: 0, kind: input, shape index: {}]   ;;  %s3478_s1 = inlined_call_operand.vmem [shape: f32[2,1,4,16], index: 1, kind: input, shape index: {}, may-alias: {1,2}]   ;;  %s3479_s2 = inlined_call_operand.vmem [shape: f32[2,1,4,16], index: 2, kind: input, shape index: {}, may-alias: {1,2}]   ;;  %s3480_s3 = inlined_call_operand.vmem [shape: f32[2,1,33], index: 3, kind: input, shape index: {}]   ;;  %s3481_s4 = inlined_call_operand.vmem [shape: f32[4,56], index: 4, kind: input, shape index: {}]   ;;  %s3482_s5 = inlined_call_operand.vmem [shape: f32[1,8], index: 5, kind: input, shape index: {}]   ;;  %s3483_s6 = inlined_call_operand.vmem [shape: f32[8,24], index: 6, kind: input, shape index: {}]   ;;  %s3484_s7 = inlined_call_operand.vmem [shape: f32[1,8], index: 7, kind: input, shape index: {}]   ;;  %s3485_s8 = inlined_call_operand.vmem [shape: f32[8,8], index: 8, kind: input, shape index: {}]   ;;  %s3486_s9 = inlined_call_operand.vmem [shape: f32[1,8], index: 9, kind: input, shape index: {}]   ;;  %s3487_s10 = inlined_call_operand.vmem [shape: f32[8,24], index: 10, kind: input, shape index: {}]   ;;  %s3488_s11 = inlined_call_operand.vmem [shape: f32[1,8], index: 11, kind: input, shape index: {}]   ;;  %s3489_s12 = inlined_call_operand.vmem [shape: f32[8,8], index: 12, kind: input, shape index: {}]   ;;  %s3490_s13 = inlined_call_operand.vmem [shape: f32[1,8], index: 13, kind: input, shape index: {}]   ;;  %s3491_s14 = inlined_call_operand.vmem [shape: f32[56,8], index: 14, kind: input, shape index: {}]   ;;  %s3492_s15 = inlined_call_operand.vmem [shape: f32[33,8], index: 15, kind: input, shape index: {}]   ;;  %s3493_s16 = inlined_call_operand.vmem [shape: f32[33,8], index: 16, kind: input, shape index: {}]   ;;  %s3494_s17 = inlined_call_operand.vmem [shape: f32[1,8], index: 17, kind: input, shape index: {}]   ;;  %s3495_s18 = inlined_call_operand.vmem [shape: f32[2,8,4], index: 18, kind: output, shape index: {0}]   ;;  %s3496_s19 = inlined_call_operand.vmem [shape: f32[2,1,128], index: 19, kind: output, shape index: {1}]  }
   0x1   :  { %3499 = sst [smem:[#allocation6_spill]] %s3477_s0  ;;  %s3119_s0 = smov 0  }
   0x2   :  { %3500 = sst [smem:[#allocation7_spill]] %s3478_s1 }
   0x3   :  { %3501 = sst [smem:[#allocation8_spill]] %s3479_s2 }
   0x4   :  { %3502 = sst [smem:[#allocation9_spill]] %s3480_s3 }
   0x5   :  { %3503 = sst [smem:[#allocation10_spill]] %s3495_s18 }
   0x6 LB: > { %3504 = sst [smem:[#allocation3_spill]] %s3004_s30  ;;  %s42_s21 = sadd.s32 1, %s3004_s30  ;;  %s3008_s20 = sphi %s3123_s20, %s30_s20   ;;  %s3004_s30 = sphi %s3121_s30, %s3514_s30   ;;  %s3000_s0 = sphi %s3119_s0, %s3513_s0  }
   0x7   : > { %3505 = sst [smem:[#allocation4_spill]] %s3008_s20  ;;  %p2721_p0 = scmp.ge.s32.totalorder %s3008_s20, 1 }
   0x8   : > { %p44_p1 = scmp.ge.s32.totalorder %s42_s21, 2  ;;  %p594_p2 = scmp.lt.s32.totalorder %s3008_s20, 3 }
   0xa   : > { %s3516_s21 = smov (%p44_p1, %s42_s21), 0  ;;  %p595_p3 = pnand %p2721_p0, %p594_p2 }
   0xb   : > { %3506 = sst [smem:[#allocation5_spill]] %s3516_s21  ;;  %p674_p4 = scmp.lt.s32.totalorder (!%p595_p3), %s3000_s0, 1  ;;  %v808_v2 = vld [vmem:[%s3481_s4] sm:$0xf] (!%p595_p3)  ;;  %vm828_vm0 = vcmask (!%p595_p3), 1043456   ;;  %vm809_vm1 = vcmask (!%p595_p3), 31744  }
   0xc   : > { %598 = sbr.rel (%p595_p3) target bundleno = 2159 (0x86f), region = 92  ;;  %s3507_s23 = sld [smem:[#allocation7_spill]] (!%p595_p3)  ;;  %2817 = vmatprep.subr.msk.mxu1 (!%p595_p3), %vm828_vm0, %v808_v2  ;;  %vm932_vm2 = vcmask (!%p595_p3), 1046528   ;;  %vm962_vm3 = vcmask (!%p595_p3), 1045504   ;;  %vm990_vm4 = vcmask (!%p595_p3), 1044480   ;;  %vm1046_vm5 = vcmask (!%p595_p3), 1042432  }
   0xd   : > { %s3508_s26 = sld [smem:[#allocation6_spill]] (!%p595_p3)  ;;  %s3509_s30 = sld [smem:[#allocation8_spill]] (!%p595_p3)  ;;  %2818 = vmatpush3.msk.msra.mxu1 (!%p595_p3), %vm828_vm0, %v808_v2  ;;  %vm1076_vm6 = vcmask (!%p595_p3), 1041408   ;;  %v1178_v60 = vld [vmem:[%s3483_s6] sm:$0xff] (!%p595_p3)  ;;  %vm1182_vm11 = vcmask (!%p595_p3), 64512  }
   0xe   : > { %s3010_s18 = smov (!%p595_p3), 112   ;;  %s3012_s20 = smov (!%p595_p3), 96   ;;  %2828 = vmatprep.subr.mxu1 (!%p595_p3), %v1178_v60 }
   0xf   : > { %s3015_s22 = smov (!%p595_p3), 80   ;;  %s3511_s3 = sld [smem:[#allocation10_spill]] (!%p595_p3) }
  0x13   : > { %s3518_s0 = smov (!%p674_p4, %s3000_s0), 1 }
  0x14   : > { %s2722_s1 = sshll.u32 %s3518_s0, 2 }
  0x15   : > { %s687_s24 = scalar_lea.vmem %s3507_s23, %s2722_s1  ;;  %s680_s27 = scalar_lea.vmem %s3508_s26, %s2722_s1 }
  0x16   : > { %v709_v0 = vld [vmem:[%s687_s24] sm:$0xf]  ;;  %s694_s21 = scalar_lea.vmem %s3509_s30, %s2722_s1  ;;  %s3011_s30 = smov 104  }
  0x17   : > { %710 = vxpose.xlu0.b32.start.end [1/1] (short) (narrow) %v709_v0, 16  ;;  %v775_v1 = vld [vmem:[%s694_s21] sm:$0xf]  ;;  %s3013_s21 = smov 120   ;;  %s3014_s1 = smov 88  }
  0x18   : > { %776 = vxpose.xlu1.b32.start.end [1/1] (short) (narrow) %v775_v1, 16  ;;  %v742_v3 = vld [vmem:[%s680_s27] sm:$0xf]  ;;  %s3510_s27 = sld [smem:[#allocation9_spill]]  ;;  %s3456_s24 = scalar_lea.vmem %s3496_s19, %s3518_s0 }
  0x1c   : > { %743 = vxpose.xlu0.b32.start.end [1/1] (short) (narrow) %v742_v3, 16 }
  0x1e   : > { %s697_s28 = scalar_lea.vmem %s3510_s27, %s3518_s0 }
  0x97   : > { %v726_v4 = vpop.trf.xlu0 }
  0x98   : > { %2819 = vmatprep.mubr.msk.f32.mxu1 %vm809_vm1, %v726_v4  ;;  %v792_v7 = vpop.trf.xlu1 }
  0x9b   : > { %v727_v5 = vpop.trf.xlu0 }
  0x9c   : > { %2820 = vmatmul.mubr.msk.f32.vlgmr.msra.gmra.mrb[0].mxu1 %vm809_vm1, %v727_v5  ;;  %v793_v9 = vpop.trf.xlu1 }
  0x9d   : > { %2829 = vmatpush3.msra.mxu1 %v1178_v60 }
  0x9f   : > { %v759_v6 = vpop.trf.xlu0 }
  0xa0   : > { %2822 = vmatprep.mubr.msk.f32.mxu1 %vm809_vm1, %v759_v6 }
  0xa3   : > { %v760_v8 = vpop.trf.xlu0 }
  0xa4   : > { %2823 = vmatmul.mubr.msk.f32.gmra.mrb[2].mxu1 %vm809_vm1, %v760_v8 }
  0xa5   : > { %2825 = vmatprep.mubr.msk.f32.mxu1 %vm809_vm1, %v792_v7 }
  0xa8   : > { %2826 = vmatmul.mubr.msk.f32.gmra.mrb[4].mxu1 %vm809_vm1, %v793_v9 }
 0x16f   : > { %v3160_v10 = vpop.f32.mrb[0].mxu1 }
 0x170   : > { %v3162_v11 = vpop.f32.mrb[1].mxu1  ;;  %v963_v12 = vrot.slane %v3160_v10, 2  ;;  %v934_v13 = vrot.slane %v3160_v10, 1  ;;  %v991_v16 = vrot.slane %v3160_v10, 3  ;;  %v1018_v18 = vrot.slane %v3160_v10, 4 }
 0x171   : > { %v933_v14 = vrot.slane %v3162_v11, 1  ;;  %v1047_v19 = vrot.slane %v3160_v10, 5  ;;  %v1077_v20 = vrot.slane %v3160_v10, 6 }
 0x172   : > { %970 = vrot.lane.b32.xlu1 %v963_v12, %s3010_s18 }
 0x173   : > { %v935_v15 = vsel %vm932_vm2, %v933_v14, %v934_v13 }
 0x176   : > { %998 = vrot.lane.b32.xlu1 %v991_v16, %s3011_s30 }
 0x177   : > { %v3171_v17 = vpop.f32.mrb[2].mxu1 }
 0x178   : > { %v3176_v21 = vpop.f32.mrb[3].mxu1  ;;  %v966_v22 = vrot.slane %v3171_v17, 2  ;;  %v994_v23 = vrot.slane %v3171_v17, 3  ;;  %v938_v24 = vrot.slane %v3171_v17, 1  ;;  %v1021_v25 = vrot.slane %v3171_v17, 4 }
 0x179   : > { %v936_v26 = vrot.slane %v3176_v21, 1  ;;  %v964_v27 = vrot.slane %v3176_v21, 2  ;;  %v992_v28 = vrot.slane %v3176_v21, 3  ;;  %v1019_v29 = vrot.slane %v3176_v21, 4 }
 0x17a   : > { %1025 = vrot.lane.b32.xlu1 %v1018_v18, %s3012_s20  ;;  %v1048_v30 = vrot.slane %v3176_v21, 5  ;;  %v1050_v31 = vrot.slane %v3171_v17, 5  ;;  %v1078_v32 = vrot.slane %v3176_v21, 6  ;;  %v1080_v33 = vrot.slane %v3171_v17, 6 }
 0x17b   : > { %v2827_v34 = vpop.f32.mrb[4].mxu1  ;;  %v937_v35 = vsel %vm932_vm2, %v934_v13, %v936_v26  ;;  %v967_v36 = vsel %vm962_vm3, %v964_v27, %v966_v22  ;;  %v993_v37 = vsel %vm990_vm4, %v991_v16, %v992_v28  ;;  %v995_v38 = vsel %vm990_vm4, %v992_v28, %v994_v23 }
 0x17c   : > { %944 = vrot.lane.b32.xlu0 %v937_v35, %s3013_s21  ;;  %v918_v39 = vpop.f32.mrb[5].mxu1  ;;  %v939_v40 = vsel %vm932_vm2, %v936_v26, %v938_v24  ;;  %v1020_v41 = vsel %vm828_vm0, %v1018_v18, %v1019_v29  ;;  %v965_v42 = vsel %vm962_vm3, %v963_v12, %v964_v27  ;;  %v1022_v43 = vsel %vm828_vm0, %v1019_v29, %v1021_v25 }
 0x17d   : > { %v940_v44 = vrot.slane %v918_v39, 1  ;;  %v1049_v45 = vsel %vm1046_vm5, %v1047_v19, %v1048_v30  ;;  %v968_v46 = vrot.slane %v918_v39, 2  ;;  %v1051_v47 = vsel %vm1046_vm5, %v1048_v30, %v1050_v31 }
 0x17e   : > { %1056 = vrot.lane.b32.xlu1 %v1047_v19, %s3014_s1  ;;  %v996_v48 = vrot.slane %v918_v39, 3  ;;  %v1079_v49 = vsel %vm1076_vm6, %v1077_v20, %v1078_v32  ;;  %v1023_v50 = vrot.slane %v918_v39, 4  ;;  %v1081_v51 = vsel %vm1076_vm6, %v1078_v32, %v1080_v33 }
 0x17f   : > { %v941_v52 = vsel %vm932_vm2, %v938_v24, %v940_v44  ;;  %v969_v53 = vsel %vm962_vm3, %v966_v22, %v968_v46  ;;  %v1052_v54 = vrot.slane %v918_v39, 5  ;;  %v1082_v55 = vrot.slane %v918_v39, 6 }
 0x180   : > { %974 = vrot.lane.b32.xlu0 %v967_v36, %s3010_s18  ;;  %v997_v56 = vsel %vm990_vm4, %v994_v23, %v996_v48  ;;  %v1024_v57 = vsel %vm828_vm0, %v1021_v25, %v1023_v50 }
 0x181   : > { %v1053_v58 = vsel %vm1046_vm5, %v1050_v31, %v1052_v54  ;;  %v1083_v59 = vsel %vm1076_vm6, %v1080_v33, %v1082_v55  ;;  %v1134_v31 = vlaneseq }
 0x182   : > { %1086 = vrot.lane.b32.xlu1 %v1077_v20, %s3015_s22 }
 0x184   : > { %1000 = vrot.lane.b32.xlu0 %v993_v37, %s3011_s30 }
 0x186   : > { %942 = vrot.lane.b32.xlu1 %v935_v15, %s3013_s21 }
 0x188   : > { %1002 = vrot.lane.b32.xlu0 %v995_v38, %s3011_s30 }
 0x18a   : > { %946 = vrot.lane.b32.xlu1 %v939_v40, %s3013_s21 }
 0x18c   : > { %1027 = vrot.lane.b32.xlu0 %v1020_v41, %s3012_s20 }
 0x18e   : > { %972 = vrot.lane.b32.xlu1 %v965_v42, %s3010_s18 }
 0x190   : > { %1029 = vrot.lane.b32.xlu0 %v1022_v43, %s3012_s20 }
 0x192   : > { %948 = vrot.lane.b32.xlu1 %v941_v52, %s3013_s21 }
 0x194   : > { %1058 = vrot.lane.b32.xlu0 %v1049_v45, %s3014_s1 }
 0x196   : > { %976 = vrot.lane.b32.xlu1 %v969_v53, %s3010_s18 }
 0x198   : > { %1060 = vrot.lane.b32.xlu0 %v1051_v47, %s3014_s1 }
 0x19a   : > { %1004 = vrot.lane.b32.xlu1 %v997_v56, %s3011_s30 }
 0x19c   : > { %1088 = vrot.lane.b32.xlu0 %v1079_v49, %s3015_s22 }
 0x19e   : > { %1031 = vrot.lane.b32.xlu1 %v1024_v57, %s3012_s20 }
 0x1a0   : > { %1090 = vrot.lane.b32.xlu0 %v1081_v51, %s3015_s22 }
 0x1a2   : > { %1062 = vrot.lane.b32.xlu1 %v1053_v58, %s3014_s1 }
 0x1a6   : > { %1092 = vrot.lane.b32.xlu1 %v1083_v59, %s3015_s22 }
 0x1e4   : > { %v971_v61 = vpop.permute.xlu1 %970 }
 0x1e8   : > { %v999_v62 = vpop.permute.xlu1 %998 }
 0x1ec   : > { %v1026_v63 = vpop.permute.xlu1 %1025 }
 0x1ee   : > { %v945_v0 = vpop.permute.xlu0 %944 }
 0x1ef   : > { %v958_v14 = vadd.f32 %v3160_v10, %v945_v0 }
 0x1f0   : > { %v1057_v1 = vpop.permute.xlu1 %1056 }
 0x1f2   : > { %v975_v2 = vpop.permute.xlu0 %974 }
 0x1f4   : > { %v1087_v3 = vpop.permute.xlu1 %1086 }
 0x1f6   : > { %v1001_v4 = vpop.permute.xlu0 %1000 }
 0x1f8   : > { %v943_v5 = vpop.permute.xlu1 %942 }
 0x1f9   : > { %v957_v6 = vadd.f32 %v943_v5, %v3162_v11  ;;  %v2733_v11 = vld [vmem:[%s3482_s5] ss:$0 sm:$0xff] }
 0x1fa   : > { %v1003_v7 = vpop.permute.xlu0 %1002 }
 0x1fb   : > { %v985_v8 = vadd.f32 %v971_v61, %v957_v6 }
 0x1fc   : > { %v947_v9 = vpop.permute.xlu1 %946 }
 0x1fd   : > { %v1013_v12 = vadd.f32 %v999_v62, %v985_v8  ;;  %v959_v22 = vadd.f32 %v947_v9, %v3176_v21  ;;  %v3236_v21 = vshrl.u32 %v1134_v31, 7 }
 0x1fe   : > { %v1028_v13 = vpop.permute.xlu0 %1027 }
 0x1ff   : > { %v1040_v15 = vadd.f32 %v1026_v63, %v1013_v12  ;;  %v987_v27 = vadd.f32 %v975_v2, %v959_v22  ;;  %v1140_v46 = vadd.s32 4294967289, %v3236_v21  ;;  %v3242_v59 = vadd.s32 16, %v3236_v21 }
 0x200   : > { %v973_v16 = vpop.permute.xlu1 %972 }
 0x201   : > { %v986_v18 = vadd.f32 %v973_v16, %v958_v14  ;;  %v1071_v19 = vadd.f32 %v1057_v1, %v1040_v15  ;;  %v1015_v32 = vadd.f32 %v1003_v7, %v987_v27  ;;  %vm1144_vm9 = vcmp.ge.s32.totalorder %v1140_v46, 0 }
 0x202   : > { %v1030_v20 = vpop.permute.xlu0 %1029  ;;  %v1142_v2 = vadd.s32 4294967289, %v3242_v59  ;;  %v3016_v14 = vmov 0.0  }
 0x203   : > { %v1014_v24 = vadd.f32 %v1001_v4, %v986_v18  ;;  %v1101_v25 = vadd.f32 %v1087_v3, %v1071_v19  ;;  %v1042_v37 = vadd.f32 %v1030_v20, %v1015_v32  ;;  %v1180_v18 = vld [vmem:[%s3485_s8] sm:$0xff]  ;;  %2575 = vst [vmem:[%s3456_s24] sm:$0x1] %v3016_v14 }
 0x204   : > { %v949_v23 = vpop.permute.xlu1 %948  ;;  %vm1150_vm13 = vcmp.lt.s32.totalorder %v1142_v2, 16  ;;  %2836 = vmatprep.subr.mxu1 %v1180_v18 }
 0x205   : > { %v1041_v29 = vadd.f32 %v1028_v13, %v1014_v24  ;;  %v1113_v10 = vadd.f32 %v2733_v11, %v1101_v25  ;;  %v960_v38 = vadd.f32 %v3171_v17, %v949_v23 }
 0x206   : > { %v1059_v26 = vpop.permute.xlu0 %1058 }
 0x207   : > { %v1072_v34 = vadd.f32 %v1059_v26, %v1041_v29  ;;  %v1123_v36 = vmul.f32 0.2, %v1113_v10  ;;  %vm1118_vm7 = vcmp.gt.f32.partialorder %v1113_v10, 0.0 }
 0x208   : > { %v977_v28 = vpop.permute.xlu1 %976 }
 0x209   : > { %v988_v41 = vadd.f32 %v977_v28, %v960_v38  ;;  %v1128_v45 = vsel %vm1118_vm7, %v1113_v10, %v1123_v36  ;;  %v2737_v38 = vld [vmem:[%s3484_s7] ss:$0 sm:$0xff]  ;;  %vm1788_vm7 = vcmask 269312  }
 0x20a   : > { %v1061_v30 = vpop.permute.xlu0 %1060  ;;  %v1161_v17 = vrot.slane %v1128_v45, 6 }
 0x20b   : > { %v1073_v42 = vadd.f32 %v1061_v30, %v1042_v37 }
 0x20c   : > { %v1005_v33 = vpop.permute.xlu1 %1004 }
 0x20d   : > { %v1016_v47 = vadd.f32 %v1005_v33, %v988_v41 }
 0x20e   : > { %v1089_v35 = vpop.permute.xlu0 %1088 }
 0x20f   : > { %v1102_v39 = vadd.f32 %v1089_v35, %v1072_v34 }
 0x210   : > { %v1032_v40 = vpop.permute.xlu1 %1031 }
 0x211   : > { %v1114_v43 = vadd.f32 %v2733_v11, %v1102_v39  ;;  %v1043_v52 = vadd.f32 %v1032_v40, %v1016_v47 }
 0x212   : > { %v1091_v44 = vpop.permute.xlu0 %1090 }
 0x213   : > { %vm1119_vm8 = vcmp.gt.f32.partialorder %v1114_v43, 0.0  ;;  %v1124_v48 = vmul.f32 0.2, %v1114_v43  ;;  %v1103_v49 = vadd.f32 %v1091_v44, %v1073_v42 }
 0x214   : > { %v1063_v50 = vpop.permute.xlu1 %1062 }
 0x215   : > { %v1129_v51 = vsel %vm1119_vm8, %v1114_v43, %v1124_v48  ;;  %v1115_v53 = vadd.f32 %v2733_v11, %v1103_v49  ;;  %v1074_v56 = vadd.f32 %v1063_v50, %v1043_v52 }
 0x216   : > { %v1162_v54 = vrot.slane %v1129_v51, 6 }
 0x217   : > { %vm1120_vm10 = vcmp.gt.f32.partialorder %v1115_v53, 0.0  ;;  %v1125_v55 = vmul.f32 0.2, %v1115_v53 }
 0x218   : > { %v1093_v57 = vpop.permute.xlu1 %1092  ;;  %v1163_v58 = vsel %vm1076_vm6, %v1161_v17, %v1162_v54 }
 0x219   : > { %v1130_v60 = vsel %vm1120_vm10, %v1115_v53, %v1125_v55  ;;  %v1104_v61 = vadd.f32 %v1093_v57, %v1074_v56  ;;  %v1174_v62 = vsel %vm1144_vm9, %v1163_v58, 0.0  ;;  %v1492_v56 = vld [vmem:[%s3487_s10] sm:$0xff] }
 0x21a   : > { %v1164_v63 = vrot.slane %v1130_v60, 6  ;;  %2830 = vmatprep.mubr.msk.f32.mxu1 %vm1182_vm11, %v1174_v62  ;;  %v1443_v4 = vrot.slane %v1174_v62, 1  ;;  %2844 = vmatprep.subr.mxu0 %v1492_v56  ;;  %v2738_v57 = vld [vmem:[%s3486_s9] ss:$0 sm:$0xff] }
 0x21b   : > { %v1116_v0 = vadd.f32 %v2733_v11, %v1104_v61  ;;  %2845 = vmatpush3.msra.mxu0 %v1492_v56 }
 0x21c   : > { %v1165_v1 = vsel %vm1076_vm6, %v1162_v54, %v1164_v63 }
 0x21d   : > { %vm1121_vm12 = vcmp.gt.f32.partialorder %v1116_v0, 0.0  ;;  %v1126_v3 = vmul.f32 0.2, %v1116_v0  ;;  %2831 = vmatmul.mubr.msk.f32.vlgmr.msra.gmra.mrb[6].mxu1 %vm1182_vm11, %v1165_v1  ;;  %v1444_v5 = vrot.slane %v1165_v1, 1  ;;  %v1448_v1 = vrot.slane %v3016_v14, 1 }
 0x21e   : > { %2837 = vmatpush3.msra.mxu1 %v1180_v18 }
 0x21f   : > { %v1131_v6 = vsel %vm1121_vm12, %v1116_v0, %v1126_v3  ;;  %v3249_v7 = vsel %vm932_vm2, %v1443_v4, %v1444_v5  ;;  %2852 = vmatprep.subr.mxu1 %v3016_v14 }
 0x220   : > { %v1166_v8 = vrot.slane %v1131_v6, 6  ;;  %v1474_v6 = vadd.s32 4294967290, %v3242_v59 }
 0x222   : > { %v1167_v9 = vsel %vm1076_vm6, %v1164_v63, %v1166_v8  ;;  %v1472_v63 = vadd.s32 4294967290, %v3236_v21 }
 0x223   : > { %v3252_v12 = vsel %vm1150_vm13, %v1167_v9, 0.0 }
 0x224   : > { %2833 = vmatprep.mubr.msk.f32.mxu1 %vm1182_vm11, %v3252_v12  ;;  %v1446_v13 = vrot.slane %v3252_v12, 1  ;;  %vm1476_vm0 = vcmp.ge.s32.totalorder %v1472_v63, 0 }
 0x225   : > { %2834 = vmatmul.mubr.f32.gmra.mrb[8].mxu1 %v3016_v14 }
 0x226   : > { %v3261_v15 = vsel %vm932_vm2, %v1444_v5, %v1446_v13 }
 0x2f0   : > { %v2832_v16 = vpop.f32.mrb[6].mxu1 }
 0x2f1   : > { %v1285_v19 = vrot.slane %v2832_v16, 1  ;;  %v1308_v20 = vrot.slane %v2832_v16, 2  ;;  %v1261_v22 = vpop.f32.mrb[7].mxu1 }
 0x2f2   : > { %v1284_v23 = vrot.slane %v1261_v22, 1  ;;  %v1307_v24 = vrot.slane %v1261_v22, 2 }
 0x2f4   : > { %v1286_v25 = vsel %vm932_vm2, %v1284_v23, %v1285_v19  ;;  %v1309_v26 = vsel %vm962_vm3, %v1307_v24, %v1308_v20 }
 0x2f5   : > { %1291 = vrot.lane.b32.xlu0 %v1286_v25, %s3013_s21 }
 0x2f8   : > { %v2835_v27 = vpop.f32.mrb[8].mxu1 }
 0x2f9   : > { %v1289_v11 = vrot.slane %v2835_v27, 1  ;;  %v1312_v28 = vrot.slane %v2835_v27, 2  ;;  %1314 = vrot.lane.b32.xlu0 %v1309_v26, %s3010_s18  ;;  %v1271_v29 = vpop.f32.mrb[9].mxu1 }
 0x2fa   : > { %v1287_v30 = vrot.slane %v1271_v29, 1  ;;  %v1310_v10 = vrot.slane %v1271_v29, 2 }
 0x2fb   : > { %1297 = vrot.lane.b32.xlu1 %v1289_v11, %s3013_s21 }
 0x2fc   : > { %v1290_v32 = vsel %vm932_vm2, %v1287_v30, %v1289_v11  ;;  %v1288_v33 = vsel %vm932_vm2, %v1285_v19, %v1287_v30  ;;  %v1313_v34 = vsel %vm962_vm3, %v1310_v10, %v1312_v28  ;;  %v1311_v35 = vsel %vm962_vm3, %v1308_v20, %v1310_v10 }
 0x2fd   : > { %1295 = vrot.lane.b32.xlu0 %v1290_v32, %s3013_s21  ;;  %vm1482_vm3 = vcmp.lt.s32.totalorder %v1474_v6, 16 }
 0x2ff   : > { %1293 = vrot.lane.b32.xlu1 %v1288_v33, %s3013_s21 }
 0x301   : > { %1318 = vrot.lane.b32.xlu0 %v1313_v34, %s3010_s18 }
 0x303   : > { %1316 = vrot.lane.b32.xlu1 %v1311_v35, %s3010_s18 }
 0x307   : > { %1320 = vrot.lane.b32.xlu1 %v1312_v28, %s3010_s18 }
 0x367   : > { %v1292_v36 = vpop.permute.xlu0 %1291 }
 0x368   : > { %v1303_v37 = vadd.f32 %v1292_v36, %v1261_v22 }
 0x36b   : > { %v1315_v39 = vpop.permute.xlu0 %1314 }
 0x36c   : > { %v1326_v40 = vadd.f32 %v1315_v39, %v1303_v37 }
 0x36d   : > { %v1298_v41 = vpop.permute.xlu1 %1297 }
 0x36e   : > { %v1336_v42 = vadd.f32 %v2737_v38, %v1326_v40  ;;  %v1306_v51 = vadd.f32 %v2835_v27, %v1298_v41  ;;  %v1494_v27 = vld [vmem:[%s3489_s12] sm:$0xff] }
 0x36f   : > { %v1296_v43 = vpop.permute.xlu0 %1295 }
 0x370   : > { %2838 = vmatprep.mubr.msk.f32.mxu1 %vm1182_vm11, %v1336_v42  ;;  %v1305_v45 = vadd.f32 %v1296_v43, %v1271_v29 }
 0x371   : > { %v1294_v44 = vpop.permute.xlu1 %1293 }
 0x372   : > { %v1304_v47 = vadd.f32 %v2832_v16, %v1294_v44  ;;  %v1449_v16 = vsel %vm932_vm2, %v1446_v13, %v1448_v1  ;;  %vm3017_vm2 = vmmov 0   ;;  %v1867_v1 = vld [vmem:[%s3493_s16 + $0x8] sm:$0xff] }
 0x373   : > { %v1319_v46 = vpop.permute.xlu0 %1318 }
 0x374   : > { %v1328_v48 = vadd.f32 %v1319_v46, %v1305_v45 }
 0x375   : > { %v1317_v49 = vpop.permute.xlu1 %1316 }
 0x376   : > { %v1327_v50 = vadd.f32 %v1317_v49, %v1304_v47  ;;  %v1338_v53 = vadd.f32 %v2737_v38, %v1328_v48  ;;  %v2746_v48 = vld [vmem:[%s3488_s11] ss:$0 sm:$0xff] }
 0x378   : > { %v1337_v52 = vadd.f32 %v2737_v38, %v1327_v50 }
 0x379   : > { %v1321_v54 = vpop.permute.xlu1 %1320 }
 0x37a   : > { %v1329_v17 = vadd.f32 %v1321_v54, %v1306_v51  ;;  %2839 = vmatmul.mubr.msk.f32.vlgmr.msra.gmra.mrb[10].mxu1 %vm1182_vm11, %v1337_v52 }
 0x37b   : > { %2841 = vmatprep.mubr.msk.f32.mxu1 %vm1182_vm11, %v1338_v53  ;;  %2853 = vmatpush3.msra.mxu1 %v1494_v27 }
 0x37c   : > { %v1339_v55 = vadd.f32 %v2737_v38, %v1329_v17 }
 0x37e   : > { %2842 = vmatmul.mubr.msk.f32.gmra.mrb[12].mxu1 %vm1182_vm11, %v1339_v55 }
 0x37f   : > { %2854 = vmatprep.mubr.msk.f32.mxu1 %vm3017_vm2, %v3016_v14 }
 0x44d   : > { %v2840_v58 = vpop.f32.mrb[10].mxu1 }
 0x44e   : > { %v1430_v60 = vadd.f32 %v2840_v58, %v2738_v57  ;;  %v1424_v61 = vpop.f32.mrb[11].mxu1 }
 0x44f   : > { %v1425_v62 = vadd.f32 %v2738_v57, %v1424_v61  ;;  %v1783_v61 = vld [vmem:[%s3492_s15] sm:$0xff] }
 0x450   : > { %v1455_v0 = vadd.f32 %v3261_v15, %v1430_v60 }
 0x451   : > { %v1454_v2 = vadd.f32 %v3249_v7, %v1425_v62  ;;  %v2843_v3 = vpop.f32.mrb[12].mxu1  ;;  %v1784_v62 = vld [vmem:[%s3492_s15 + $0x8] sm:$0xff] }
 0x452   : > { %v1463_v4 = vmul.f32 0.2, %v1455_v0  ;;  %v1434_v5 = vpop.f32.mrb[13].mxu1  ;;  %vm1459_vm14 = vcmp.gt.f32.partialorder %v1455_v0, 0.0  ;;  %v2925_v63 = vpack.c.bf16 %v1784_v62, %v1783_v61 }
 0x453   : > { %v1435_v8 = vadd.f32 %v2738_v57, %v1434_v5  ;;  %vm1458_vm15 = vcmp.gt.f32.partialorder %v1454_v2, 0.0  ;;  %v1462_v9 = vmul.f32 0.2, %v1454_v2  ;;  %v1786_v5 = vld [vmem:[%s3492_s15 + $0x18] sm:$0xff] }
 0x454   : > { %v1467_v18 = vsel %vm1459_vm14, %v1455_v0, %v1463_v4  ;;  %v1866_v0 = vld [vmem:[%s3493_s16] sm:$0xff]  ;;  %v1785_v4 = vld [vmem:[%s3492_s15 + $0x10] sm:$0xff]  ;;  %vm1780_vm14 = vcmask 62464  }
 0x455   : > { %v1456_v15 = vadd.f32 %v1449_v16, %v1435_v8  ;;  %v1466_v19 = vsel %vm1458_vm15, %v1454_v2, %v1462_v9  ;;  %v1740_v23 = vrot.slane %v1467_v18, 3  ;;  %v3018_v2 = vmov 0.0|0.0   ;;  %v1868_v8 = vld [vmem:[%s3493_s16 + $0x10] sm:$0xff]  ;;  %v1869_v9 = vld [vmem:[%s3493_s16 + $0x18] sm:$0xff] }
 0x456   : > { %v1488_v20 = vsel %vm1476_vm0, %v1466_v19, 0.0  ;;  %2924 = vmatprep.subr.bf16.mxu0 %v3018_v2  ;;  %2930 = vmatprep.subr.bf16.mxu1 %v3018_v2  ;;  %v2931_v3 = vpack.c.bf16 %v1867_v1, %v1866_v0  ;;  %v2928_v6 = vpack.c.bf16 %v1786_v5, %v1785_v4  ;;  %v2934_v16 = vpack.c.bf16 %v1869_v9, %v1868_v8  ;;  %v1870_v19 = vld [vmem:[%s3493_s16 + $0x20] sm:$0x1] }
 0x457   : > { %v1464_v7 = vmul.f32 0.2, %v1456_v15  ;;  %2846 = vmatprep.mubr.msk.f32.mxu0 %vm1182_vm11, %v1488_v20  ;;  %v1739_v22 = vrot.slane %v1488_v20, 3  ;;  %vm1460_vm5 = vcmp.gt.f32.partialorder %v1456_v15, 0.0  ;;  %v1968_v20 = vld [vmem:[%s3491_s14] sm:$0xff]  ;;  %vm2544_vm15 = vcmask 60416  }
 0x458   : > { %2847 = vmatmul.mubr.msk.f32.vlgmr.msra.gmra.mrb[0].mxu0 %vm1182_vm11, %v1467_v18  ;;  %v1787_v18 = vld [vmem:[%s3492_s15 + $0x20] sm:$0x1] }
 0x459   : > { %v1468_v24 = vsel %vm1460_vm5, %v1456_v15, %v1464_v7  ;;  %v3305_v25 = vsel %vm990_vm4, %v1739_v22, %v1740_v23  ;;  %2926 = vmatpush3.bf16.msra.mxu0 %v2925_v63  ;;  %v1782_v15 = vld [vmem:[%s697_s28] sm:$0x1] }
 0x45a   : > { %v3307_v12 = vsel %vm1482_vm3, %v1468_v24, 0.0  ;;  %2927 = vmatprep.subr.bf16.mxu0 %v3018_v2  ;;  %v2747_v7 = vld [vmem:[%s3490_s13] ss:$0 sm:$0xff]  ;;  %v1763_v24 = vadd.s32 4294967293, %v3236_v21 }
 0x45b   : > { %2849 = vmatprep.mubr.msk.f32.mxu0 %vm1182_vm11, %v3307_v12  ;;  %v1742_v13 = vrot.slane %v3307_v12, 3  ;;  %v2122_v12 = vld [vmem:[%s3491_s14 + $0x10] sm:$0xff]  ;;  %v2755_v63 = vld [vmem:[%s3494_s17] ss:$0 sm:$0xff] }
 0x45c   : > { %2850 = vmatmul.mubr.f32.gmra.mrb[2].mxu0 %v3016_v14  ;;  %vm1766_vm9 = vcmp.ge.s32.totalorder %v1763_v24, 0 }
 0x45d   : > { %v3316_v26 = vsel %vm990_vm4, %v1740_v23, %v1742_v13  ;;  %2873 = vmatprep.mubr.msk.f32.mxu0 %vm3017_vm2, %v3016_v14  ;;  %2929 = vmatpush3.bf16.msra.mxu0 %v2928_v6 }
 0x45e   : > { %2871 = vmatprep.subr.mxu0 %v3016_v14 }
 0x52b   : > { %v2848_v11 = vpop.f32.mrb[0].mxu0 }
 0x52c   : > { %v1598_v28 = vrot.slane %v2848_v11, 3  ;;  %v1617_v29 = vrot.slane %v2848_v11, 6  ;;  %v1574_v30 = vpop.f32.mrb[1].mxu0 }
 0x52d   : > { %v1597_v10 = vrot.slane %v1574_v30, 3  ;;  %v1616_v32 = vrot.slane %v1574_v30, 6 }
 0x52f   : > { %v2851_v33 = vpop.f32.mrb[2].mxu0  ;;  %v1618_v34 = vsel %vm1076_vm6, %v1616_v32, %v1617_v29  ;;  %v1599_v35 = vsel %vm990_vm4, %v1597_v10, %v1598_v28  ;;  %v1744_v32 = vrot.slane %v3016_v14, 3 }
 0x530   : > { %v1602_v36 = vrot.slane %v2851_v33, 3  ;;  %v1621_v37 = vrot.slane %v2851_v33, 6  ;;  %1623 = vrot.lane.b32.xlu1 %v1618_v34, %s3010_s18  ;;  %1604 = vrot.lane.b32.xlu0 %v1599_v35, %s3013_s21  ;;  %v1584_v38 = vpop.f32.mrb[3].mxu0 }
 0x531   : > { %v1600_v39 = vrot.slane %v1584_v38, 3  ;;  %v1619_v40 = vrot.slane %v1584_v38, 6 }
 0x533   : > { %v1620_v41 = vsel %vm1076_vm6, %v1617_v29, %v1619_v40  ;;  %v1601_v42 = vsel %vm990_vm4, %v1598_v28, %v1600_v39  ;;  %v1622_v43 = vsel %vm1076_vm6, %v1619_v40, %v1621_v37  ;;  %v1603_v44 = vsel %vm990_vm4, %v1600_v39, %v1602_v36 }
 0x534   : > { %1625 = vrot.lane.b32.xlu1 %v1620_v41, %s3010_s18  ;;  %1606 = vrot.lane.b32.xlu0 %v1601_v42, %s3013_s21  ;;  %vm1792_vm6 = vcmask 1040384   ;;  %v1745_v40 = vsel %vm990_vm4, %v1742_v13, %v1744_v32  ;;  %vm1944_vm4 = vcmp.eq.s32.totalorder %v3236_v21, 0 }
 0x535   : > { %2872 = vmatpush3.msk.msra.mxu0 %vm1792_vm6, %v1787_v18 }
 0x536   : > { %2874 = vmatmul.mubr.msk.f32.vlgmr.msra.gmra.mrb[4].mxu0 %vm1788_vm7, %v1782_v15  ;;  %2889 = vmatprep.subr.mxu0 %v3016_v14 }
 0x537   : > { %2890 = vmatpush3.msra.mxu0 %v1968_v20  ;;  %2891 = vmatprep.mubr.msk.f32.mxu0 %vm3017_vm2, %v3016_v14 }
 0x538   : > { %1627 = vrot.lane.b32.xlu1 %v1622_v43, %s3010_s18  ;;  %1608 = vrot.lane.b32.xlu0 %v1603_v44, %s3013_s21  ;;  %s2725_s18 = sshll.u32 %s3518_s0, 3 }
 0x539   : > { %2894 = vmatprep.subr.mxu0 %v3016_v14  ;;  %s704_s26 = scalar_lea.vmem %s3511_s3, %s2725_s18 }
 0x5a2   : > { %v1605_v45 = vpop.permute.xlu0 %1604  ;;  %v1624_v46 = vpop.permute.xlu1 %1623 }
 0x5a3   : > { %v1613_v47 = vadd.f32 %v1605_v45, %v1574_v30 }
 0x5a5   : > { %v1632_v49 = vadd.f32 %v1624_v46, %v1613_v47  ;;  %v2199_v46 = vld [vmem:[%s3491_s14 + $0x18] sm:$0xff] }
 0x5a6   : > { %v1607_v50 = vpop.permute.xlu0 %1606  ;;  %v1626_v51 = vpop.permute.xlu1 %1625 }
 0x5a7   : > { %v1641_v52 = vadd.f32 %v2746_v48, %v1632_v49  ;;  %v1614_v53 = vadd.f32 %v2848_v11, %v1607_v50  ;;  %v2353_v50 = vld [vmem:[%s3491_s14 + $0x28] sm:$0xff] }
 0x5a9   : > { %v1633_v54 = vadd.f32 %v1626_v51, %v1614_v53  ;;  %2855 = vmatmul.mubr.msk.f32.vlgmr.msra.gmra.mrb[14].mxu1 %vm1182_vm11, %v1641_v52  ;;  %v2430_v52 = vld [vmem:[%s3491_s14 + $0x30] sm:$0xff] }
 0x5aa   : > { %v1609_v17 = vpop.permute.xlu0 %1608  ;;  %2857 = vmatprep.mubr.msk.f32.mxu1 %vm3017_vm2, %v3016_v14  ;;  %v1628_v57 = vpop.permute.xlu1 %1627  ;;  %2932 = vmatpush3.bf16.msra.mxu1 %v2931_v3 }
 0x5ab   : > { %v1642_v55 = vadd.f32 %v2746_v48, %v1633_v54  ;;  %v1615_v56 = vadd.f32 %v1609_v17, %v1584_v38  ;;  %2933 = vmatprep.subr.bf16.mxu1 %v3018_v2  ;;  %v1952_v17 = vsub.s32 0, %v3236_v21 }
 0x5ad   : > { %v1634_v58 = vadd.f32 %v1628_v57, %v1615_v56  ;;  %2858 = vmatmul.mubr.msk.f32.gmra.mrb[16].mxu1 %vm1182_vm11, %v1642_v55 }
 0x5ae   : > { %2860 = vmatprep.mubr.msk.f32.mxu1 %vm3017_vm2, %v3016_v14  ;;  %2935 = vmatpush3.bf16.msra.mxu1 %v2934_v16 }
 0x5af   : > { %v1643_v60 = vadd.f32 %v2746_v48, %v1634_v58  ;;  %2884 = vmatprep.subr.mxu1 %v3016_v14  ;;  %v2276_v48 = vld [vmem:[%s3491_s14 + $0x20] sm:$0xff] }
 0x5b1   : > { %2861 = vmatmul.mubr.msk.f32.gmra.mrb[18].mxu1 %vm1182_vm11, %v1643_v60 }
 0x5b2   : > { %2886 = vmatprep.mubr.msk.f32.mxu1 %vm3017_vm2, %v3016_v14  ;;  %2885 = vmatpush3.msk.msra.mxu1 %vm1792_vm6, %v1870_v19 }
 0x5b5   : > { %2887 = vmatmul.mubr.msk.f32.vlgmr.msra.gmra.mrb[20].mxu1 %vm1788_vm7, %v1782_v15 }
 0x609   : > { %v1862_v55 = vpop.f32.mrb[4].mxu0 }
 0x60a   : > { %v1957_v56 = vrot.slane %v1862_v55, %v1952_v17  ;;  %v2875_v57 = vpop.f32.mrb[5].mxu0 }
 0x67c   : > { %v1725_v22 = vpop.f32.mrb[14].mxu1 }
 0x67d   : > { %v1726_v23 = vadd.f32 %v2747_v7, %v1725_v22  ;;  %v2856_v27 = vpop.f32.mrb[15].mxu1 }
 0x67f   : > { %v1749_v11 = vadd.f32 %v3305_v25, %v1726_v23  ;;  %v1765_v25 = vadd.s32 4294967293, %v3242_v59  ;;  %v2045_v59 = vld [vmem:[%s3491_s14 + $0x8] sm:$0xff] }
 0x680   : > { %v1730_v28 = vpop.f32.mrb[16].mxu1 }
 0x681   : > { %vm1752_vm8 = vcmp.gt.f32.partialorder %v1749_v11, 0.0  ;;  %v1755_v29 = vmul.f32 0.2, %v1749_v11  ;;  %v1731_v30 = vadd.f32 %v2747_v7, %v1730_v28  ;;  %v2859_v10 = vpop.f32.mrb[17].mxu1  ;;  %vm1771_vm13 = vcmp.lt.s32.totalorder %v1765_v25, 16 }
 0x683   : > { %v1758_v33 = vsel %vm1752_vm8, %v1749_v11, %v1755_v29  ;;  %v1750_v34 = vadd.f32 %v3316_v26, %v1731_v30  ;;  %v2542_v30 = vand.u32 127, %v1134_v31 }
 0x684   : > { %v1775_v35 = vsel %vm1766_vm9, %v1758_v33, 0.0  ;;  %v1735_v36 = vpop.f32.mrb[18].mxu1 }
 0x685   : > { %1778 = vst.msk [vmem:[#allocation2] sm:$0xff] %vm1182_vm11, %v1775_v35  ;;  %vm1753_vm10 = vcmp.gt.f32.partialorder %v1750_v34, 0.0  ;;  %v1756_v37 = vmul.f32 0.2, %v1750_v34  ;;  %v1736_v38 = vadd.f32 %v2747_v7, %v1735_v36  ;;  %v2862_v39 = vpop.f32.mrb[19].mxu1  ;;  %vm2543_vm0 = vcmp.eq.s32.totalorder %v2542_v30, 0 }
 0x686   : > { %vm2557_vm3 = vcmp.eq.s32.totalorder %v2542_v30, 1  ;;  %v2576_v35 = vld [vmem:[%s3456_s24] sm:$0x1] }
 0x687   : > { %v1759_v41 = vsel %vm1753_vm10, %v1750_v34, %v1756_v37  ;;  %v1751_v42 = vadd.f32 %v1745_v40, %v1736_v38 }
 0x688   : > { %1779 = vst.msk [vmem:[#allocation2 + $0x8] sm:$0xff] %vm1182_vm11, %v1759_v41  ;;  %v1940_v58 = vpop.f32.mrb[20].mxu1 }
 0x689   : > { %vm1754_vm12 = vcmp.gt.f32.partialorder %v1751_v42, 0.0  ;;  %v1757_v26 = vmul.f32 0.2, %v1751_v42  ;;  %v1953_v60 = vrot.slane %v1940_v58, %v1952_v17  ;;  %v2888_v61 = vpop.f32.mrb[21].mxu1 }
 0x68b   : > { %v1760_v43 = vsel %vm1754_vm12, %v1751_v42, %v1757_v26  ;;  %v1958_v62 = vsel %vm1944_vm4, %v1953_v60, %v1957_v56 }
 0x68c   : > { %v1777_v44 = vsel %vm1771_vm13, %v1760_v43, 0.0  ;;  %v1966_v0 = vadd.f32 %v2755_v63, %v1958_v62 }
 0x68d   : > { %1781 = vst.msk [vmem:[#allocation2 + $0x10] sm:$0x3f] %vm1780_vm14, %v1777_v44 }
 0x68f   : > { %v1967_v45 = vld [vmem:[#allocation2] ss:$4 sm:$0xf]  ;;  %v2044_v13 = vld [vmem:[#allocation2 + $0x1] ss:$4 sm:$0xf] }
 0x690   : > { %2892 = vmatmul.mubr.msk.f32.vlgmr.msra.gmra.mrb[6].mxu0 %vm1182_vm11, %v1967_v45  ;;  %v2121_v47 = vld [vmem:[#allocation2 + $0x2] ss:$4 sm:$0xf]  ;;  %v2198_v49 = vld [vmem:[#allocation2 + $0x3] ss:$4 sm:$0xf] }
 0x691   : > { %2895 = vmatpush3.msra.mxu0 %v2045_v59  ;;  %2896 = vmatprep.mubr.msk.f32.mxu0 %vm3017_vm2, %v3016_v14 }
 0x692   : > { %2899 = vmatprep.subr.mxu0 %v3016_v14 }
 0x694   : > { %v2275_v51 = vld [vmem:[#allocation2 + $0x4] ss:$4 sm:$0xf]  ;;  %v2352_v53 = vld [vmem:[#allocation2 + $0x5] ss:$4 sm:$0xf] }
 0x695   : > { %v2429_v54 = vld [vmem:[#allocation2 + $0x6] ss:$4 sm:$0xf] }
 0x698   : > { %2897 = vmatmul.mubr.msk.f32.vlgmr.msra.gmra.mrb[6].mxu0 %vm1182_vm11, %v2044_v13 }
 0x699   : > { %2900 = vmatpush3.msra.mxu0 %v2122_v12  ;;  %2901 = vmatprep.mubr.msk.f32.mxu0 %vm3017_vm2, %v3016_v14 }
 0x69a   : > { %2904 = vmatprep.subr.mxu0 %v3016_v14 }
 0x6a0   : > { %2902 = vmatmul.mubr.msk.f32.vlgmr.msra.gmra.mrb[6].mxu0 %vm1182_vm11, %v2121_v47 }
 0x6a1   : > { %2905 = vmatpush3.msra.mxu0 %v2199_v46  ;;  %2906 = vmatprep.mubr.msk.f32.mxu0 %vm3017_vm2, %v3016_v14 }
 0x6a2   : > { %2909 = vmatprep.subr.mxu0 %v3016_v14 }
 0x6a8   : > { %2907 = vmatmul.mubr.msk.f32.vlgmr.msra.gmra.mrb[6].mxu0 %vm1182_vm11, %v2198_v49 }
 0x6a9   : > { %2910 = vmatpush3.msra.mxu0 %v2276_v48  ;;  %2911 = vmatprep.mubr.msk.f32.mxu0 %vm3017_vm2, %v3016_v14 }
 0x6aa   : > { %2914 = vmatprep.subr.mxu0 %v3016_v14 }
 0x6b0   : > { %2912 = vmatmul.mubr.msk.f32.vlgmr.msra.gmra.mrb[6].mxu0 %vm1182_vm11, %v2275_v51 }
 0x6b1   : > { %2915 = vmatpush3.msra.mxu0 %v2353_v50  ;;  %2916 = vmatprep.mubr.msk.f32.mxu0 %vm3017_vm2, %v3016_v14 }
 0x6b2   : > { %2919 = vmatprep.subr.mxu0 %v3016_v14 }
 0x6b8   : > { %2917 = vmatmul.mubr.msk.f32.vlgmr.msra.gmra.mrb[6].mxu0 %vm1182_vm11, %v2352_v53 }
 0x6b9   : > { %2920 = vmatpush3.msra.mxu0 %v2430_v52  ;;  %2921 = vmatprep.mubr.msk.f32.mxu0 %vm3017_vm2, %v3016_v14 }
 0x6c0   : > { %2922 = vmatmul.mubr.msk.f32.vlgmr.msra.gmra.mrb[6].mxu0 %vm1182_vm11, %v2429_v54 }
 0x793   : > { %v2500_v1 = vpop.f32.mrb[6].mxu0 }
 0x794   : > { %v2936_v2 = vadd.f32 %v2500_v1, %v1966_v0  ;;  %v2923_v3 = vpop.f32.mrb[7].mxu0 }
 0x796   : > { %v2506_v4 = vmul.f32 0.2, %v2936_v2  ;;  %vm2505_vm11 = vcmp.gt.f32.partialorder %v2936_v2, 0.0 }
 0x798   : > { %v2507_v5 = vsel %vm2505_vm11, %v2936_v2, %v2506_v4 }
 0x799   : > { %v2545_v6 = vsel %vm2544_vm15, %v2507_v5, 0.0  ;;  %v2558_v8 = vmul.f32 %v2507_v5, %v2507_v5 }
 0x79a   : > { %2546 = vadd.xlane.f32.xlu0 %v2545_v6 }
 0x79b   : > { %v2559_v21 = vsel %vm2544_vm15, %v2558_v8, 0.0 }
 0x79c   : > { %2560 = vadd.xlane.f32.xlu1 %v2559_v21 }
 0x7c7   : > { %2508 = vxpose.xlu0.b32.start.end [1/1] (short) (narrow) %v2507_v5, 8 }
 0x827   : > { %v2547_v9 = vpop.xlane.xlu0 %2546 }
 0x828   : > { %v2548_v16 = vrot.slane %v2547_v9, 4 }
 0x829   : > { %v2561_v18 = vpop.xlane.xlu1 %2560 }
 0x82a   : > { %v2549_v15 = vadd.f32 %v2548_v16, %v2547_v9  ;;  %v2562_v19 = vrot.slane %v2561_v18, 4 }
 0x82c   : > { %v2550_v20 = vrot.slane %v2549_v15, 2  ;;  %v2563_v7 = vadd.f32 %v2562_v19, %v2561_v18 }
 0x82e   : > { %v2564_v22 = vrot.slane %v2563_v7, 2  ;;  %v2551_v23 = vadd.f32 %v2550_v20, %v2549_v15 }
 0x830   : > { %v2565_v24 = vadd.f32 %v2564_v22, %v2563_v7  ;;  %v2552_v27 = vrot.slane %v2551_v23, 1 }
 0x832   : > { %v2553_v11 = vadd.f32 %v2552_v27, %v2551_v23  ;;  %v2566_v28 = vrot.slane %v2565_v24, 1 }
 0x834   : > { %2949 = vpush %v2553_v11  ;;  %v2567_v29 = vadd.f32 %v2566_v28, %v2565_v24 }
 0x836   : > { %2951 = vpush %v2567_v29 }
 0x847   : > { %v2524_v14 = vpop.trf.xlu0 }
 0x848   : > { %2540 = vst.msk [vmem:[%s704_s26] sm:$0xff] %vm809_vm1, %v2524_v14 }
 0x865   : > { %s2950_s27 = spop %2949 }
 0x866   : > { %v2555_v10 = vstv %s2950_s27 }
 0x867   : > { %s2952_s28 = spop %2951  ;;  %v2556_v33 = vsel %vm2543_vm0, %v2555_v10, 0.0 }
 0x868   : > { %v2569_v32 = vstv %s2952_s28 }
 0x869   : > { %v2570_v34 = vsel %vm2557_vm3, %v2569_v32, 0.0 }
 0x86a   : > { %v2571_v36 = vadd.f32 %v2570_v34, %v2556_v33 }
 0x86c   : > { %v2577_v37 = vadd.f32 %v2576_v35, %v2571_v36 }
 0x86e   : > { %2578 = vst [vmem:[%s3456_s24] sm:$0x1] %v2577_v37 }
 0x86f PF: > { %s3512_s0 = sld [smem:[#allocation4_spill]]  ;;  %s3514_s30 = sld [smem:[#allocation5_spill]] }
 0x875   : > { %s30_s20 = sadd.s32 1, %s3512_s0   ;;  %s3513_s0 = sld [smem:[#allocation3_spill]] }
 0x876   : > { %p27_p5 = scmp.ge.s32.totalorder %s30_s20, 4  }
 0x878   :  { %29 = sbr.rel (!%p27_p5) target bundleno = 6 (0x6), region = 153 }

</bundles_post_ra>
